<compile_context>
chip_gen: v6e
topology: v6e:2x2x1
jax: 0.10.0
libtpu: 0.0.40
codegen_flags: <defaults>
</compile_context>

<pallas_src>
import functools

import jax
import jax.numpy as jnp
from jax.experimental import pallas as pl
from jax.experimental.pallas import tpu as pltpu  # noqa: F401 (kept for scale-up tiling)


# ----------------------------------------------------------------------------
# Fused forward kernel: all LSTM layers + FC projection, no grid (one call).
# refs layout: emb, (W_ih^T, W_hh^T, b) * L, fc_w^T, fc_b, logits, h_n, c_n
# ----------------------------------------------------------------------------
def _fused_forward_kernel(num_layers, seq_len, batch, *refs):
    idx = 0
    emb_ref = refs[idx]; idx += 1
    layer_refs = []
    for _ in range(num_layers):
        layer_refs.append((refs[idx], refs[idx + 1], refs[idx + 2]))
        idx += 3
    fcw_ref = refs[idx]; fcb_ref = refs[idx + 1]; idx += 2
    logits_ref, hn_ref, cn_ref = refs[idx], refs[idx + 1], refs[idx + 2]

    H = layer_refs[0][1].shape[0]                      # W_hh^T is (H, 4H)
    half = jnp.float32(0.5)

    # Lane-index mask for the g-gate (tanh) lanes, hoisted out of every loop
    # (broadcast_in_dim is not CSE'd by JAX).
    lane = jax.lax.broadcasted_iota(jnp.int32, (batch, 4 * H), 1)
    is_g = (lane >= 2 * H) & (lane < 3 * H)

    x_all = emb_ref[...]                               # (T*Bp, E) time-major rows
    for layer in range(num_layers):
        wih_ref, whh_ref, b_ref = layer_refs[layer]

        # Hoisted input projection: one dense matmul over all T*Bp rows.
        gin = (jnp.dot(x_all, wih_ref[...], preferred_element_type=jnp.float32)
               + b_ref[...])                           # (T*Bp, 4H)
        whh = whh_ref[...]                             # (H, 4H), read once

        h = jnp.zeros((batch, H), jnp.float32)         # hidden=None -> zeros
        c = jnp.zeros((batch, H), jnp.float32)
        hs = []

        for t in range(seq_len):                       # serial recurrence (static)
            gates = gin[t * batch:(t + 1) * batch, :] + jnp.dot(
                h, whh, preferred_element_type=jnp.float32)      # (Bp, 4H)
            # Single EUP pass: sigmoid(x) = 0.5*tanh(0.5*x) + 0.5, so pre-scale
            # the non-g lanes by 0.5, tanh everything, then affine-correct.
            pre = jnp.where(is_g, gates, gates * half)
            th = jnp.tanh(pre)
            act = jnp.where(is_g, th, th * half + half)
            i_g = act[:, 0 * H:1 * H]
            f_g = act[:, 1 * H:2 * H]
            g_g = act[:, 2 * H:3 * H]
            o_g = act[:, 3 * H:4 * H]
            c = f_g * c + i_g * g_g
            h = o_g * jnp.tanh(c)
            hs.append(h)                               # stays in vregs

        hn_ref[layer] = h                              # written once per layer
        cn_ref[layer] = c
        # Next layer's input: tile-aligned (8-row pieces) value concat, no
        # scratch store/reload on the serial path.
        x_all = jnp.concatenate(hs, axis=0)            # (T*Bp, H)

    # FC epilogue: one (T*Bp, H) @ (H, Vp) matmul, lane-dense (Vp % 128 == 0).
    logits_ref[...] = (jnp.dot(x_all, fcw_ref[...],
                               preferred_element_type=jnp.float32)
                       + fcb_ref[...]).astype(logits_ref.dtype)


# ----------------------------------------------------------------------------
# Parameter construction (deterministic, PyTorch-shaped), one-time layout pass,
# and the forward wrapper.
# ----------------------------------------------------------------------------
def init_params(key, vocab_size, embed_size, hidden_size, num_layers):
    keys = jax.random.split(key, 3 + 4 * num_layers)
    k = iter(keys)
    bound = 1.0 / jnp.sqrt(hidden_size)

    params = {
        "embedding": jax.random.normal(next(k), (vocab_size, embed_size),
                                       jnp.float32),
        "lstm": [],
        "fc_w": jax.random.uniform(next(k), (vocab_size, hidden_size),
                                   jnp.float32, -bound, bound),
        "fc_b": jax.random.uniform(next(k), (vocab_size,),
                                   jnp.float32, -bound, bound),
    }
    for layer in range(num_layers):
        in_size = embed_size if layer == 0 else hidden_size
        w_ih = jax.random.uniform(next(k), (4 * hidden_size, in_size),
                                  jnp.float32, -bound, bound)
        w_hh = jax.random.uniform(next(k), (4 * hidden_size, hidden_size),
                                  jnp.float32, -bound, bound)
        b_ih = jax.random.uniform(next(k), (4 * hidden_size,),
                                  jnp.float32, -bound, bound)
        b_hh = jax.random.uniform(next(k), (4 * hidden_size,),
                                  jnp.float32, -bound, bound)
        params["lstm"].append((w_ih, w_hh, b_ih, b_hh))
    return params


def prepare_params(params):
    """One-time layout pass: transpose weights, fuse biases, pad FC to 128 lanes.
    Hoisted out of the per-call forward so no per-step re-transpose / re-pad."""
    fc_w = params["fc_w"]
    fc_b = params["fc_b"]
    V, H = fc_w.shape
    Vp = ((V + 127) // 128) * 128
    layers = []
    for (w_ih, w_hh, b_ih, b_hh) in params["lstm"]:
        layers.append((w_ih.T,                          # (in, 4H)
                       w_hh.T,                          # (H, 4H)
                       (b_ih + b_hh).reshape(1, -1)))   # fused bias (1, 4H)
    fc_w_t = jnp.zeros((H, Vp), jnp.float32).at[:, :V].set(fc_w.T)
    fc_b_p = jnp.zeros((1, Vp), jnp.float32).at[:, :V].set(fc_b.reshape(1, V))
    return {"embedding": params["embedding"], "layers": layers,
            "fc_w_t": fc_w_t, "fc_b_p": fc_b_p}


@functools.partial(jax.jit, static_argnames=("hidden_size", "num_layers"))
def rizzline_forward(x_tokens, prepped, hidden_size, num_layers):
    """x_tokens: (B, T) int32 token ids.
    Returns (logits (B, T, vocab), (h_n, c_n) each (num_layers, B, H))."""
    B, T = x_tokens.shape
    H = hidden_size
    V = prepped["embedding"].shape[0]
    Vp = prepped["fc_w_t"].shape[1]
    Bp = ((B + 7) // 8) * 8                            # pad batch to f32 sublane tile

    # Embedding gather: plain JAX glue (not the compute hot path).
    embedded = prepped["embedding"][x_tokens]          # (B, T, E)
    emb_tm = jnp.transpose(embedded, (1, 0, 2))        # time-major (T, B, E)
    E = emb_tm.shape[-1]
    emb_pad = jnp.zeros((T, Bp, E), jnp.float32).at[:, :B, :].set(emb_tm)
    emb_flat = emb_pad.reshape(T * Bp, E)              # row index = t*Bp + b

    args = [emb_flat]
    for wih_t, whh_t, b in prepped["layers"]:
        args += [wih_t, whh_t, b]
    args += [prepped["fc_w_t"], prepped["fc_b_p"]]

    kernel = functools.partial(_fused_forward_kernel, num_layers, T, Bp)
    logits_flat_p, h_n_p, c_n_p = pl.pallas_call(
        kernel,
        out_shape=(
            jax.ShapeDtypeStruct((T * Bp, Vp), jnp.float32),
            jax.ShapeDtypeStruct((num_layers, Bp, H), jnp.float32),
            jax.ShapeDtypeStruct((num_layers, Bp, H), jnp.float32),
        ),
    )(*args)

    logits = jnp.transpose(
        logits_flat_p.reshape(T, Bp, Vp)[:, :B, :V], (1, 0, 2))  # (B, T, V)
    return logits, (h_n_p[:, :B, :], c_n_p[:, :B, :])


if __name__ == "__main__":
    vocab_size, embed_size, hidden_size, num_layers = 64, 32, 32, 2
    batch, seq = 2, 8

    key = jax.random.PRNGKey(0)
    pkey, xkey = jax.random.split(key)
    params = init_params(pkey, vocab_size, embed_size, hidden_size, num_layers)
    prepped = prepare_params(params)                   # one-time layout pass
    x_tokens = jax.random.randint(xkey, (batch, seq), 0, vocab_size, jnp.int32)

    logits, (h_n, c_n) = rizzline_forward(x_tokens, prepped,
                                          hidden_size=hidden_size,
                                          num_layers=num_layers)
    jax.block_until_ready((logits, h_n, c_n))

    assert logits.shape == (batch, seq, vocab_size)
    assert h_n.shape == (num_layers, batch, hidden_size)
    assert c_n.shape == (num_layers, batch, hidden_size)
    assert bool(jnp.all(jnp.isfinite(logits)))
    assert bool(jnp.all(jnp.isfinite(h_n))) and bool(jnp.all(jnp.isfinite(c_n)))
    print("KERNEL_OK")
</pallas_src>

<mosaic_0001>
module attributes {stable_mosaic.version = 11 : i64} {
  func.func @_fused_forward_kernel(%arg0: memref<64x32xf32, #tpu.memory_space<vmem>>, %arg1: memref<32x128xf32, #tpu.memory_space<vmem>>, %arg2: memref<32x128xf32, #tpu.memory_space<vmem>>, %arg3: memref<1x128xf32, #tpu.memory_space<vmem>>, %arg4: memref<32x128xf32, #tpu.memory_space<vmem>>, %arg5: memref<32x128xf32, #tpu.memory_space<vmem>>, %arg6: memref<1x128xf32, #tpu.memory_space<vmem>>, %arg7: memref<32x128xf32, #tpu.memory_space<vmem>>, %arg8: memref<1x128xf32, #tpu.memory_space<vmem>>, %arg9: memref<64x128xf32, #tpu.memory_space<vmem>>, %arg10: memref<2x8x32xf32, #tpu.memory_space<vmem>>, %arg11: memref<2x8x32xf32, #tpu.memory_space<vmem>>) attributes {dimension_semantics = [], scalar_prefetch = 0 : i64, scratch_operands = 0 : i64, tpu.core_type = #tpu.core_type<tc>} {
    %0 = tpu.iota {dimensions = array<i32: 1>} : vector<8x128xi32>
    %c64_i32 = arith.constant 64 : i32
    %1 = vector.broadcast %c64_i32 : i32 to vector<8x128xi32>
    %2 = arith.cmpi sge, %0, %1 : vector<8x128xi32>
    %c96_i32 = arith.constant 96 : i32
    %3 = vector.broadcast %c96_i32 : i32 to vector<8x128xi32>
    %4 = arith.cmpi slt, %0, %3 : vector<8x128xi32>
    %5 = arith.andi %2, %4 : vector<8x128xi1>
    %c0 = arith.constant 0 : index
    %c0_0 = arith.constant 0 : index
    %6 = vector.load %arg0[%c0, %c0_0] : memref<64x32xf32, #tpu.memory_space<vmem>>, vector<64x32xf32>
    %c0_1 = arith.constant 0 : index
    %c0_2 = arith.constant 0 : index
    %7 = vector.load %arg1[%c0_1, %c0_2] : memref<32x128xf32, #tpu.memory_space<vmem>>, vector<32x128xf32>
    %cst = arith.constant dense<0.000000e+00> : vector<64x128xf32>
    %8 = tpu.matmul %6, %7, %cst {dimension_numbers = #tpu.dot_dimension_numbers<[1], [0], [0], [1], [0, 0, 1, 1], [], []>} : vector<64x32xf32>, vector<32x128xf32>, vector<64x128xf32> -> vector<64x128xf32>
    %c0_3 = arith.constant 0 : index
    %c0_4 = arith.constant 0 : index
    %9 = vector.load %arg3[%c0_3, %c0_4] : memref<1x128xf32, #tpu.memory_space<vmem>>, vector<1x128xf32>
    %10 = vector.broadcast %9 : vector<1x128xf32> to vector<64x128xf32>
    %11 = arith.addf %8, %10 : vector<64x128xf32>
    %c0_5 = arith.constant 0 : index
    %c0_6 = arith.constant 0 : index
    %12 = vector.load %arg2[%c0_5, %c0_6] : memref<32x128xf32, #tpu.memory_space<vmem>>, vector<32x128xf32>
    %cst_7 = arith.constant 0.000000e+00 : f32
    %13 = vector.broadcast %cst_7 : f32 to vector<8x32xf32>
    %cst_8 = arith.constant 0.000000e+00 : f32
    %14 = vector.broadcast %cst_8 : f32 to vector<8x32xf32>
    %15 = vector.extract_strided_slice %11 {offsets = [0, 0], sizes = [8, 128], strides = [1, 1]} : vector<64x128xf32> to vector<8x128xf32>
    %cst_9 = arith.constant dense<0.000000e+00> : vector<8x128xf32>
    %16 = tpu.matmul %13, %12, %cst_9 {dimension_numbers = #tpu.dot_dimension_numbers<[1], [0], [0], [1], [0, 0, 1, 1], [], []>} : vector<8x32xf32>, vector<32x128xf32>, vector<8x128xf32> -> vector<8x128xf32>
    %17 = arith.addf %15, %16 : vector<8x128xf32>
    %cst_10 = arith.constant 5.000000e-01 : f32
    %18 = vector.broadcast %cst_10 : f32 to vector<8x128xf32>
    %19 = arith.mulf %17, %18 : vector<8x128xf32>
    %20 = arith.select %5, %17, %19 : vector<8x128xi1>, vector<8x128xf32>
    %21 = math.tanh %20 : vector<8x128xf32>
    %cst_11 = arith.constant 5.000000e-01 : f32
    %22 = vector.broadcast %cst_11 : f32 to vector<8x128xf32>
    %23 = arith.mulf %21, %22 : vector<8x128xf32>
    %cst_12 = arith.constant 5.000000e-01 : f32
    %24 = vector.broadcast %cst_12 : f32 to vector<8x128xf32>
    %25 = arith.addf %23, %24 : vector<8x128xf32>
    %26 = arith.select %5, %21, %25 : vector<8x128xi1>, vector<8x128xf32>
    %27 = vector.extract_strided_slice %26 {offsets = [0, 0], sizes = [8, 32], strides = [1, 1]} : vector<8x128xf32> to vector<8x32xf32>
    %28 = vector.extract_strided_slice %26 {offsets = [0, 32], sizes = [8, 32], strides = [1, 1]} : vector<8x128xf32> to vector<8x32xf32>
    %29 = vector.extract_strided_slice %26 {offsets = [0, 64], sizes = [8, 32], strides = [1, 1]} : vector<8x128xf32> to vector<8x32xf32>
    %30 = vector.extract_strided_slice %26 {offsets = [0, 96], sizes = [8, 32], strides = [1, 1]} : vector<8x128xf32> to vector<8x32xf32>
    %31 = arith.mulf %28, %14 : vector<8x32xf32>
    %32 = arith.mulf %27, %29 : vector<8x32xf32>
    %33 = arith.addf %31, %32 : vector<8x32xf32>
    %34 = math.tanh %33 : vector<8x32xf32>
    %35 = arith.mulf %30, %34 : vector<8x32xf32>
    %36 = vector.extract_strided_slice %11 {offsets = [8, 0], sizes = [8, 128], strides = [1, 1]} : vector<64x128xf32> to vector<8x128xf32>
    %cst_13 = arith.constant dense<0.000000e+00> : vector<8x128xf32>
    %37 = tpu.matmul %35, %12, %cst_13 {dimension_numbers = #tpu.dot_dimension_numbers<[1], [0], [0], [1], [0, 0, 1, 1], [], []>} : vector<8x32xf32>, vector<32x128xf32>, vector<8x128xf32> -> vector<8x128xf32>
    %38 = arith.addf %36, %37 : vector<8x128xf32>
    %cst_14 = arith.constant 5.000000e-01 : f32
    %39 = vector.broadcast %cst_14 : f32 to vector<8x128xf32>
    %40 = arith.mulf %38, %39 : vector<8x128xf32>
    %41 = arith.select %5, %38, %40 : vector<8x128xi1>, vector<8x128xf32>
    %42 = math.tanh %41 : vector<8x128xf32>
    %cst_15 = arith.constant 5.000000e-01 : f32
    %43 = vector.broadcast %cst_15 : f32 to vector<8x128xf32>
    %44 = arith.mulf %42, %43 : vector<8x128xf32>
    %cst_16 = arith.constant 5.000000e-01 : f32
    %45 = vector.broadcast %cst_16 : f32 to vector<8x128xf32>
    %46 = arith.addf %44, %45 : vector<8x128xf32>
    %47 = arith.select %5, %42, %46 : vector<8x128xi1>, vector<8x128xf32>
    %48 = vector.extract_strided_slice %47 {offsets = [0, 0], sizes = [8, 32], strides = [1, 1]} : vector<8x128xf32> to vector<8x32xf32>
    %49 = vector.extract_strided_slice %47 {offsets = [0, 32], sizes = [8, 32], strides = [1, 1]} : vector<8x128xf32> to vector<8x32xf32>
    %50 = vector.extract_strided_slice %47 {offsets = [0, 64], sizes = [8, 32], strides = [1, 1]} : vector<8x128xf32> to vector<8x32xf32>
    %51 = vector.extract_strided_slice %47 {offsets = [0, 96], sizes = [8, 32], strides = [1, 1]} : vector<8x128xf32> to vector<8x32xf32>
    %52 = arith.mulf %49, %33 : vector<8x32xf32>
    %53 = arith.mulf %48, %50 : vector<8x32xf32>
    %54 = arith.addf %52, %53 : vector<8x32xf32>
    %55 = math.tanh %54 : vector<8x32xf32>
    %56 = arith.mulf %51, %55 : vector<8x32xf32>
    %57 = vector.extract_strided_slice %11 {offsets = [16, 0], sizes = [8, 128], strides = [1, 1]} : vector<64x128xf32> to vector<8x128xf32>
    %cst_17 = arith.constant dense<0.000000e+00> : vector<8x128xf32>
    %58 = tpu.matmul %56, %12, %cst_17 {dimension_numbers = #tpu.dot_dimension_numbers<[1], [0], [0], [1], [0, 0, 1, 1], [], []>} : vector<8x32xf32>, vector<32x128xf32>, vector<8x128xf32> -> vector<8x128xf32>
    %59 = arith.addf %57, %58 : vector<8x128xf32>
    %cst_18 = arith.constant 5.000000e-01 : f32
    %60 = vector.broadcast %cst_18 : f32 to vector<8x128xf32>
    %61 = arith.mulf %59, %60 : vector<8x128xf32>
    %62 = arith.select %5, %59, %61 : vector<8x128xi1>, vector<8x128xf32>
    %63 = math.tanh %62 : vector<8x128xf32>
    %cst_19 = arith.constant 5.000000e-01 : f32
    %64 = vector.broadcast %cst_19 : f32 to vector<8x128xf32>
    %65 = arith.mulf %63, %64 : vector<8x128xf32>
    %cst_20 = arith.constant 5.000000e-01 : f32
    %66 = vector.broadcast %cst_20 : f32 to vector<8x128xf32>
    %67 = arith.addf %65, %66 : vector<8x128xf32>
    %68 = arith.select %5, %63, %67 : vector<8x128xi1>, vector<8x128xf32>
    %69 = vector.extract_strided_slice %68 {offsets = [0, 0], sizes = [8, 32], strides = [1, 1]} : vector<8x128xf32> to vector<8x32xf32>
    %70 = vector.extract_strided_slice %68 {offsets = [0, 32], sizes = [8, 32], strides = [1, 1]} : vector<8x128xf32> to vector<8x32xf32>
    %71 = vector.extract_strided_slice %68 {offsets = [0, 64], sizes = [8, 32], strides = [1, 1]} : vector<8x128xf32> to vector<8x32xf32>
    %72 = vector.extract_strided_slice %68 {offsets = [0, 96], sizes = [8, 32], strides = [1, 1]} : vector<8x128xf32> to vector<8x32xf32>
    %73 = arith.mulf %70, %54 : vector<8x32xf32>
    %74 = arith.mulf %69, %71 : vector<8x32xf32>
    %75 = arith.addf %73, %74 : vector<8x32xf32>
    %76 = math.tanh %75 : vector<8x32xf32>
    %77 = arith.mulf %72, %76 : vector<8x32xf32>
    %78 = vector.extract_strided_slice %11 {offsets = [24, 0], sizes = [8, 128], strides = [1, 1]} : vector<64x128xf32> to vector<8x128xf32>
    %cst_21 = arith.constant dense<0.000000e+00> : vector<8x128xf32>
    %79 = tpu.matmul %77, %12, %cst_21 {dimension_numbers = #tpu.dot_dimension_numbers<[1], [0], [0], [1], [0, 0, 1, 1], [], []>} : vector<8x32xf32>, vector<32x128xf32>, vector<8x128xf32> -> vector<8x128xf32>
    %80 = arith.addf %78, %79 : vector<8x128xf32>
    %cst_22 = arith.constant 5.000000e-01 : f32
    %81 = vector.broadcast %cst_22 : f32 to vector<8x128xf32>
    %82 = arith.mulf %80, %81 : vector<8x128xf32>
    %83 = arith.select %5, %80, %82 : vector<8x128xi1>, vector<8x128xf32>
    %84 = math.tanh %83 : vector<8x128xf32>
    %cst_23 = arith.constant 5.000000e-01 : f32
    %85 = vector.broadcast %cst_23 : f32 to vector<8x128xf32>
    %86 = arith.mulf %84, %85 : vector<8x128xf32>
    %cst_24 = arith.constant 5.000000e-01 : f32
    %87 = vector.broadcast %cst_24 : f32 to vector<8x128xf32>
    %88 = arith.addf %86, %87 : vector<8x128xf32>
    %89 = arith.select %5, %84, %88 : vector<8x128xi1>, vector<8x128xf32>
    %90 = vector.extract_strided_slice %89 {offsets = [0, 0], sizes = [8, 32], strides = [1, 1]} : vector<8x128xf32> to vector<8x32xf32>
    %91 = vector.extract_strided_slice %89 {offsets = [0, 32], sizes = [8, 32], strides = [1, 1]} : vector<8x128xf32> to vector<8x32xf32>
    %92 = vector.extract_strided_slice %89 {offsets = [0, 64], sizes = [8, 32], strides = [1, 1]} : vector<8x128xf32> to vector<8x32xf32>
    %93 = vector.extract_strided_slice %89 {offsets = [0, 96], sizes = [8, 32], strides = [1, 1]} : vector<8x128xf32> to vector<8x32xf32>
    %94 = arith.mulf %91, %75 : vector<8x32xf32>
    %95 = arith.mulf %90, %92 : vector<8x32xf32>
    %96 = arith.addf %94, %95 : vector<8x32xf32>
    %97 = math.tanh %96 : vector<8x32xf32>
    %98 = arith.mulf %93, %97 : vector<8x32xf32>
    %99 = vector.extract_strided_slice %11 {offsets = [32, 0], sizes = [8, 128], strides = [1, 1]} : vector<64x128xf32> to vector<8x128xf32>
    %cst_25 = arith.constant dense<0.000000e+00> : vector<8x128xf32>
    %100 = tpu.matmul %98, %12, %cst_25 {dimension_numbers = #tpu.dot_dimension_numbers<[1], [0], [0], [1], [0, 0, 1, 1], [], []>} : vector<8x32xf32>, vector<32x128xf32>, vector<8x128xf32> -> vector<8x128xf32>
    %101 = arith.addf %99, %100 : vector<8x128xf32>
    %cst_26 = arith.constant 5.000000e-01 : f32
    %102 = vector.broadcast %cst_26 : f32 to vector<8x128xf32>
    %103 = arith.mulf %101, %102 : vector<8x128xf32>
    %104 = arith.select %5, %101, %103 : vector<8x128xi1>, vector<8x128xf32>
    %105 = math.tanh %104 : vector<8x128xf32>
    %cst_27 = arith.constant 5.000000e-01 : f32
    %106 = vector.broadcast %cst_27 : f32 to vector<8x128xf32>
    %107 = arith.mulf %105, %106 : vector<8x128xf32>
    %cst_28 = arith.constant 5.000000e-01 : f32
    %108 = vector.broadcast %cst_28 : f32 to vector<8x128xf32>
    %109 = arith.addf %107, %108 : vector<8x128xf32>
    %110 = arith.select %5, %105, %109 : vector<8x128xi1>, vector<8x128xf32>
    %111 = vector.extract_strided_slice %110 {offsets = [0, 0], sizes = [8, 32], strides = [1, 1]} : vector<8x128xf32> to vector<8x32xf32>
    %112 = vector.extract_strided_slice %110 {offsets = [0, 32], sizes = [8, 32], strides = [1, 1]} : vector<8x128xf32> to vector<8x32xf32>
    %113 = vector.extract_strided_slice %110 {offsets = [0, 64], sizes = [8, 32], strides = [1, 1]} : vector<8x128xf32> to vector<8x32xf32>
    %114 = vector.extract_strided_slice %110 {offsets = [0, 96], sizes = [8, 32], strides = [1, 1]} : vector<8x128xf32> to vector<8x32xf32>
    %115 = arith.mulf %112, %96 : vector<8x32xf32>
    %116 = arith.mulf %111, %113 : vector<8x32xf32>
    %117 = arith.addf %115, %116 : vector<8x32xf32>
    %118 = math.tanh %117 : vector<8x32xf32>
    %119 = arith.mulf %114, %118 : vector<8x32xf32>
    %120 = vector.extract_strided_slice %11 {offsets = [40, 0], sizes = [8, 128], strides = [1, 1]} : vector<64x128xf32> to vector<8x128xf32>
    %cst_29 = arith.constant dense<0.000000e+00> : vector<8x128xf32>
    %121 = tpu.matmul %119, %12, %cst_29 {dimension_numbers = #tpu.dot_dimension_numbers<[1], [0], [0], [1], [0, 0, 1, 1], [], []>} : vector<8x32xf32>, vector<32x128xf32>, vector<8x128xf32> -> vector<8x128xf32>
    %122 = arith.addf %120, %121 : vector<8x128xf32>
    %cst_30 = arith.constant 5.000000e-01 : f32
    %123 = vector.broadcast %cst_30 : f32 to vector<8x128xf32>
    %124 = arith.mulf %122, %123 : vector<8x128xf32>
    %125 = arith.select %5, %122, %124 : vector<8x128xi1>, vector<8x128xf32>
    %126 = math.tanh %125 : vector<8x128xf32>
    %cst_31 = arith.constant 5.000000e-01 : f32
    %127 = vector.broadcast %cst_31 : f32 to vector<8x128xf32>
    %128 = arith.mulf %126, %127 : vector<8x128xf32>
    %cst_32 = arith.constant 5.000000e-01 : f32
    %129 = vector.broadcast %cst_32 : f32 to vector<8x128xf32>
    %130 = arith.addf %128, %129 : vector<8x128xf32>
    %131 = arith.select %5, %126, %130 : vector<8x128xi1>, vector<8x128xf32>
    %132 = vector.extract_strided_slice %131 {offsets = [0, 0], sizes = [8, 32], strides = [1, 1]} : vector<8x128xf32> to vector<8x32xf32>
    %133 = vector.extract_strided_slice %131 {offsets = [0, 32], sizes = [8, 32], strides = [1, 1]} : vector<8x128xf32> to vector<8x32xf32>
    %134 = vector.extract_strided_slice %131 {offsets = [0, 64], sizes = [8, 32], strides = [1, 1]} : vector<8x128xf32> to vector<8x32xf32>
    %135 = vector.extract_strided_slice %131 {offsets = [0, 96], sizes = [8, 32], strides = [1, 1]} : vector<8x128xf32> to vector<8x32xf32>
    %136 = arith.mulf %133, %117 : vector<8x32xf32>
    %137 = arith.mulf %132, %134 : vector<8x32xf32>
    %138 = arith.addf %136, %137 : vector<8x32xf32>
    %139 = math.tanh %138 : vector<8x32xf32>
    %140 = arith.mulf %135, %139 : vector<8x32xf32>
    %141 = vector.extract_strided_slice %11 {offsets = [48, 0], sizes = [8, 128], strides = [1, 1]} : vector<64x128xf32> to vector<8x128xf32>
    %cst_33 = arith.constant dense<0.000000e+00> : vector<8x128xf32>
    %142 = tpu.matmul %140, %12, %cst_33 {dimension_numbers = #tpu.dot_dimension_numbers<[1], [0], [0], [1], [0, 0, 1, 1], [], []>} : vector<8x32xf32>, vector<32x128xf32>, vector<8x128xf32> -> vector<8x128xf32>
    %143 = arith.addf %141, %142 : vector<8x128xf32>
    %cst_34 = arith.constant 5.000000e-01 : f32
    %144 = vector.broadcast %cst_34 : f32 to vector<8x128xf32>
    %145 = arith.mulf %143, %144 : vector<8x128xf32>
    %146 = arith.select %5, %143, %145 : vector<8x128xi1>, vector<8x128xf32>
    %147 = math.tanh %146 : vector<8x128xf32>
    %cst_35 = arith.constant 5.000000e-01 : f32
    %148 = vector.broadcast %cst_35 : f32 to vector<8x128xf32>
    %149 = arith.mulf %147, %148 : vector<8x128xf32>
    %cst_36 = arith.constant 5.000000e-01 : f32
    %150 = vector.broadcast %cst_36 : f32 to vector<8x128xf32>
    %151 = arith.addf %149, %150 : vector<8x128xf32>
    %152 = arith.select %5, %147, %151 : vector<8x128xi1>, vector<8x128xf32>
    %153 = vector.extract_strided_slice %152 {offsets = [0, 0], sizes = [8, 32], strides = [1, 1]} : vector<8x128xf32> to vector<8x32xf32>
    %154 = vector.extract_strided_slice %152 {offsets = [0, 32], sizes = [8, 32], strides = [1, 1]} : vector<8x128xf32> to vector<8x32xf32>
    %155 = vector.extract_strided_slice %152 {offsets = [0, 64], sizes = [8, 32], strides = [1, 1]} : vector<8x128xf32> to vector<8x32xf32>
    %156 = vector.extract_strided_slice %152 {offsets = [0, 96], sizes = [8, 32], strides = [1, 1]} : vector<8x128xf32> to vector<8x32xf32>
    %157 = arith.mulf %154, %138 : vector<8x32xf32>
    %158 = arith.mulf %153, %155 : vector<8x32xf32>
    %159 = arith.addf %157, %158 : vector<8x32xf32>
    %160 = math.tanh %159 : vector<8x32xf32>
    %161 = arith.mulf %156, %160 : vector<8x32xf32>
    %162 = vector.extract_strided_slice %11 {offsets = [56, 0], sizes = [8, 128], strides = [1, 1]} : vector<64x128xf32> to vector<8x128xf32>
    %cst_37 = arith.constant dense<0.000000e+00> : vector<8x128xf32>
    %163 = tpu.matmul %161, %12, %cst_37 {dimension_numbers = #tpu.dot_dimension_numbers<[1], [0], [0], [1], [0, 0, 1, 1], [], []>} : vector<8x32xf32>, vector<32x128xf32>, vector<8x128xf32> -> vector<8x128xf32>
    %164 = arith.addf %162, %163 : vector<8x128xf32>
    %cst_38 = arith.constant 5.000000e-01 : f32
    %165 = vector.broadcast %cst_38 : f32 to vector<8x128xf32>
    %166 = arith.mulf %164, %165 : vector<8x128xf32>
    %167 = arith.select %5, %164, %166 : vector<8x128xi1>, vector<8x128xf32>
    %168 = math.tanh %167 : vector<8x128xf32>
    %cst_39 = arith.constant 5.000000e-01 : f32
    %169 = vector.broadcast %cst_39 : f32 to vector<8x128xf32>
    %170 = arith.mulf %168, %169 : vector<8x128xf32>
    %cst_40 = arith.constant 5.000000e-01 : f32
    %171 = vector.broadcast %cst_40 : f32 to vector<8x128xf32>
    %172 = arith.addf %170, %171 : vector<8x128xf32>
    %173 = arith.select %5, %168, %172 : vector<8x128xi1>, vector<8x128xf32>
    %174 = vector.extract_strided_slice %173 {offsets = [0, 0], sizes = [8, 32], strides = [1, 1]} : vector<8x128xf32> to vector<8x32xf32>
    %175 = vector.extract_strided_slice %173 {offsets = [0, 32], sizes = [8, 32], strides = [1, 1]} : vector<8x128xf32> to vector<8x32xf32>
    %176 = vector.extract_strided_slice %173 {offsets = [0, 64], sizes = [8, 32], strides = [1, 1]} : vector<8x128xf32> to vector<8x32xf32>
    %177 = vector.extract_strided_slice %173 {offsets = [0, 96], sizes = [8, 32], strides = [1, 1]} : vector<8x128xf32> to vector<8x32xf32>
    %178 = arith.mulf %175, %159 : vector<8x32xf32>
    %179 = arith.mulf %174, %176 : vector<8x32xf32>
    %180 = arith.addf %178, %179 : vector<8x32xf32>
    %181 = math.tanh %180 : vector<8x32xf32>
    %182 = arith.mulf %177, %181 : vector<8x32xf32>
    %c0_41 = arith.constant 0 : index
    %c0_42 = arith.constant 0 : index
    %c0_43 = arith.constant 0 : index
    %183 = vector.load %arg10[%c0_41, %c0_42, %c0_43] : memref<2x8x32xf32, #tpu.memory_space<vmem>>, vector<1x8x32xf32>
    %184 = vector.shape_cast %183 : vector<1x8x32xf32> to vector<8x32xf32>
    %185 = vector.shape_cast %182 : vector<8x32xf32> to vector<1x8x32xf32>
    tpu.vector_store %arg10[%c0_41, %c0_42, %c0_43], %185 {strides = array<i32>} : memref<2x8x32xf32, #tpu.memory_space<vmem>>, vector<1x8x32xf32>,
    %c0_44 = arith.constant 0 : index
    %c0_45 = arith.constant 0 : index
    %c0_46 = arith.constant 0 : index
    %186 = vector.load %arg11[%c0_44, %c0_45, %c0_46] : memref<2x8x32xf32, #tpu.memory_space<vmem>>, vector<1x8x32xf32>
    %187 = vector.shape_cast %186 : vector<1x8x32xf32> to vector<8x32xf32>
    %188 = vector.shape_cast %180 : vector<8x32xf32> to vector<1x8x32xf32>
    tpu.vector_store %arg11[%c0_44, %c0_45, %c0_46], %188 {strides = array<i32>} : memref<2x8x32xf32, #tpu.memory_space<vmem>>, vector<1x8x32xf32>,
    %189 = tpu.concatenate %35, %56, %77, %98, %119, %140, %161, %182 in 0 : vector<8x32xf32>, vector<8x32xf32>, vector<8x32xf32>, vector<8x32xf32>, vector<8x32xf32>, vector<8x32xf32>, vector<8x32xf32>, vector<8x32xf32> -> vector<64x32xf32>
    %c0_47 = arith.constant 0 : index
    %c0_48 = arith.constant 0 : index
    %190 = vector.load %arg4[%c0_47, %c0_48] : memref<32x128xf32, #tpu.memory_space<vmem>>, vector<32x128xf32>
    %cst_49 = arith.constant dense<0.000000e+00> : vector<64x128xf32>
    %191 = tpu.matmul %189, %190, %cst_49 {dimension_numbers = #tpu.dot_dimension_numbers<[1], [0], [0], [1], [0, 0, 1, 1], [], []>} : vector<64x32xf32>, vector<32x128xf32>, vector<64x128xf32> -> vector<64x128xf32>
    %c0_50 = arith.constant 0 : index
    %c0_51 = arith.constant 0 : index
    %192 = vector.load %arg6[%c0_50, %c0_51] : memref<1x128xf32, #tpu.memory_space<vmem>>, vector<1x128xf32>
    %193 = vector.broadcast %192 : vector<1x128xf32> to vector<64x128xf32>
    %194 = arith.addf %191, %193 : vector<64x128xf32>
    %c0_52 = arith.constant 0 : index
    %c0_53 = arith.constant 0 : index
    %195 = vector.load %arg5[%c0_52, %c0_53] : memref<32x128xf32, #tpu.memory_space<vmem>>, vector<32x128xf32>
    %cst_54 = arith.constant 0.000000e+00 : f32
    %196 = vector.broadcast %cst_54 : f32 to vector<8x32xf32>
    %cst_55 = arith.constant 0.000000e+00 : f32
    %197 = vector.broadcast %cst_55 : f32 to vector<8x32xf32>
    %198 = vector.extract_strided_slice %194 {offsets = [0, 0], sizes = [8, 128], strides = [1, 1]} : vector<64x128xf32> to vector<8x128xf32>
    %cst_56 = arith.constant dense<0.000000e+00> : vector<8x128xf32>
    %199 = tpu.matmul %196, %195, %cst_56 {dimension_numbers = #tpu.dot_dimension_numbers<[1], [0], [0], [1], [0, 0, 1, 1], [], []>} : vector<8x32xf32>, vector<32x128xf32>, vector<8x128xf32> -> vector<8x128xf32>
    %200 = arith.addf %198, %199 : vector<8x128xf32>
    %cst_57 = arith.constant 5.000000e-01 : f32
    %201 = vector.broadcast %cst_57 : f32 to vector<8x128xf32>
    %202 = arith.mulf %200, %201 : vector<8x128xf32>
    %203 = arith.select %5, %200, %202 : vector<8x128xi1>, vector<8x128xf32>
    %204 = math.tanh %203 : vector<8x128xf32>
    %cst_58 = arith.constant 5.000000e-01 : f32
    %205 = vector.broadcast %cst_58 : f32 to vector<8x128xf32>
    %206 = arith.mulf %204, %205 : vector<8x128xf32>
    %cst_59 = arith.constant 5.000000e-01 : f32
    %207 = vector.broadcast %cst_59 : f32 to vector<8x128xf32>
    %208 = arith.addf %206, %207 : vector<8x128xf32>
    %209 = arith.select %5, %204, %208 : vector<8x128xi1>, vector<8x128xf32>
    %210 = vector.extract_strided_slice %209 {offsets = [0, 0], sizes = [8, 32], strides = [1, 1]} : vector<8x128xf32> to vector<8x32xf32>
    %211 = vector.extract_strided_slice %209 {offsets = [0, 32], sizes = [8, 32], strides = [1, 1]} : vector<8x128xf32> to vector<8x32xf32>
    %212 = vector.extract_strided_slice %209 {offsets = [0, 64], sizes = [8, 32], strides = [1, 1]} : vector<8x128xf32> to vector<8x32xf32>
    %213 = vector.extract_strided_slice %209 {offsets = [0, 96], sizes = [8, 32], strides = [1, 1]} : vector<8x128xf32> to vector<8x32xf32>
    %214 = arith.mulf %211, %197 : vector<8x32xf32>
    %215 = arith.mulf %210, %212 : vector<8x32xf32>
    %216 = arith.addf %214, %215 : vector<8x32xf32>
    %217 = math.tanh %216 : vector<8x32xf32>
    %218 = arith.mulf %213, %217 : vector<8x32xf32>
    %219 = vector.extract_strided_slice %194 {offsets = [8, 0], sizes = [8, 128], strides = [1, 1]} : vector<64x128xf32> to vector<8x128xf32>
    %cst_60 = arith.constant dense<0.000000e+00> : vector<8x128xf32>
    %220 = tpu.matmul %218, %195, %cst_60 {dimension_numbers = #tpu.dot_dimension_numbers<[1], [0], [0], [1], [0, 0, 1, 1], [], []>} : vector<8x32xf32>, vector<32x128xf32>, vector<8x128xf32> -> vector<8x128xf32>
    %221 = arith.addf %219, %220 : vector<8x128xf32>
    %cst_61 = arith.constant 5.000000e-01 : f32
    %222 = vector.broadcast %cst_61 : f32 to vector<8x128xf32>
    %223 = arith.mulf %221, %222 : vector<8x128xf32>
    %224 = arith.select %5, %221, %223 : vector<8x128xi1>, vector<8x128xf32>
    %225 = math.tanh %224 : vector<8x128xf32>
    %cst_62 = arith.constant 5.000000e-01 : f32
    %226 = vector.broadcast %cst_62 : f32 to vector<8x128xf32>
    %227 = arith.mulf %225, %226 : vector<8x128xf32>
    %cst_63 = arith.constant 5.000000e-01 : f32
    %228 = vector.broadcast %cst_63 : f32 to vector<8x128xf32>
    %229 = arith.addf %227, %228 : vector<8x128xf32>
    %230 = arith.select %5, %225, %229 : vector<8x128xi1>, vector<8x128xf32>
    %231 = vector.extract_strided_slice %230 {offsets = [0, 0], sizes = [8, 32], strides = [1, 1]} : vector<8x128xf32> to vector<8x32xf32>
    %232 = vector.extract_strided_slice %230 {offsets = [0, 32], sizes = [8, 32], strides = [1, 1]} : vector<8x128xf32> to vector<8x32xf32>
    %233 = vector.extract_strided_slice %230 {offsets = [0, 64], sizes = [8, 32], strides = [1, 1]} : vector<8x128xf32> to vector<8x32xf32>
    %234 = vector.extract_strided_slice %230 {offsets = [0, 96], sizes = [8, 32], strides = [1, 1]} : vector<8x128xf32> to vector<8x32xf32>
    %235 = arith.mulf %232, %216 : vector<8x32xf32>
    %236 = arith.mulf %231, %233 : vector<8x32xf32>
    %237 = arith.addf %235, %236 : vector<8x32xf32>
    %238 = math.tanh %237 : vector<8x32xf32>
    %239 = arith.mulf %234, %238 : vector<8x32xf32>
    %240 = vector.extract_strided_slice %194 {offsets = [16, 0], sizes = [8, 128], strides = [1, 1]} : vector<64x128xf32> to vector<8x128xf32>
    %cst_64 = arith.constant dense<0.000000e+00> : vector<8x128xf32>
    %241 = tpu.matmul %239, %195, %cst_64 {dimension_numbers = #tpu.dot_dimension_numbers<[1], [0], [0], [1], [0, 0, 1, 1], [], []>} : vector<8x32xf32>, vector<32x128xf32>, vector<8x128xf32> -> vector<8x128xf32>
    %242 = arith.addf %240, %241 : vector<8x128xf32>
    %cst_65 = arith.constant 5.000000e-01 : f32
    %243 = vector.broadcast %cst_65 : f32 to vector<8x128xf32>
    %244 = arith.mulf %242, %243 : vector<8x128xf32>
    %245 = arith.select %5, %242, %244 : vector<8x128xi1>, vector<8x128xf32>
    %246 = math.tanh %245 : vector<8x128xf32>
    %cst_66 = arith.constant 5.000000e-01 : f32
    %247 = vector.broadcast %cst_66 : f32 to vector<8x128xf32>
    %248 = arith.mulf %246, %247 : vector<8x128xf32>
    %cst_67 = arith.constant 5.000000e-01 : f32
    %249 = vector.broadcast %cst_67 : f32 to vector<8x128xf32>
    %250 = arith.addf %248, %249 : vector<8x128xf32>
    %251 = arith.select %5, %246, %250 : vector<8x128xi1>, vector<8x128xf32>
    %252 = vector.extract_strided_slice %251 {offsets = [0, 0], sizes = [8, 32], strides = [1, 1]} : vector<8x128xf32> to vector<8x32xf32>
    %253 = vector.extract_strided_slice %251 {offsets = [0, 32], sizes = [8, 32], strides = [1, 1]} : vector<8x128xf32> to vector<8x32xf32>
    %254 = vector.extract_strided_slice %251 {offsets = [0, 64], sizes = [8, 32], strides = [1, 1]} : vector<8x128xf32> to vector<8x32xf32>
    %255 = vector.extract_strided_slice %251 {offsets = [0, 96], sizes = [8, 32], strides = [1, 1]} : vector<8x128xf32> to vector<8x32xf32>
    %256 = arith.mulf %253, %237 : vector<8x32xf32>
    %257 = arith.mulf %252, %254 : vector<8x32xf32>
    %258 = arith.addf %256, %257 : vector<8x32xf32>
    %259 = math.tanh %258 : vector<8x32xf32>
    %260 = arith.mulf %255, %259 : vector<8x32xf32>
    %261 = vector.extract_strided_slice %194 {offsets = [24, 0], sizes = [8, 128], strides = [1, 1]} : vector<64x128xf32> to vector<8x128xf32>
    %cst_68 = arith.constant dense<0.000000e+00> : vector<8x128xf32>
    %262 = tpu.matmul %260, %195, %cst_68 {dimension_numbers = #tpu.dot_dimension_numbers<[1], [0], [0], [1], [0, 0, 1, 1], [], []>} : vector<8x32xf32>, vector<32x128xf32>, vector<8x128xf32> -> vector<8x128xf32>
    %263 = arith.addf %261, %262 : vector<8x128xf32>
    %cst_69 = arith.constant 5.000000e-01 : f32
    %264 = vector.broadcast %cst_69 : f32 to vector<8x128xf32>
    %265 = arith.mulf %263, %264 : vector<8x128xf32>
    %266 = arith.select %5, %263, %265 : vector<8x128xi1>, vector<8x128xf32>
    %267 = math.tanh %266 : vector<8x128xf32>
    %cst_70 = arith.constant 5.000000e-01 : f32
    %268 = vector.broadcast %cst_70 : f32 to vector<8x128xf32>
    %269 = arith.mulf %267, %268 : vector<8x128xf32>
    %cst_71 = arith.constant 5.000000e-01 : f32
    %270 = vector.broadcast %cst_71 : f32 to vector<8x128xf32>
    %271 = arith.addf %269, %270 : vector<8x128xf32>
    %272 = arith.select %5, %267, %271 : vector<8x128xi1>, vector<8x128xf32>
    %273 = vector.extract_strided_slice %272 {offsets = [0, 0], sizes = [8, 32], strides = [1, 1]} : vector<8x128xf32> to vector<8x32xf32>
    %274 = vector.extract_strided_slice %272 {offsets = [0, 32], sizes = [8, 32], strides = [1, 1]} : vector<8x128xf32> to vector<8x32xf32>
    %275 = vector.extract_strided_slice %272 {offsets = [0, 64], sizes = [8, 32], strides = [1, 1]} : vector<8x128xf32> to vector<8x32xf32>
    %276 = vector.extract_strided_slice %272 {offsets = [0, 96], sizes = [8, 32], strides = [1, 1]} : vector<8x128xf32> to vector<8x32xf32>
    %277 = arith.mulf %274, %258 : vector<8x32xf32>
    %278 = arith.mulf %273, %275 : vector<8x32xf32>
    %279 = arith.addf %277, %278 : vector<8x32xf32>
    %280 = math.tanh %279 : vector<8x32xf32>
    %281 = arith.mulf %276, %280 : vector<8x32xf32>
    %282 = vector.extract_strided_slice %194 {offsets = [32, 0], sizes = [8, 128], strides = [1, 1]} : vector<64x128xf32> to vector<8x128xf32>
    %cst_72 = arith.constant dense<0.000000e+00> : vector<8x128xf32>
    %283 = tpu.matmul %281, %195, %cst_72 {dimension_numbers = #tpu.dot_dimension_numbers<[1], [0], [0], [1], [0, 0, 1, 1], [], []>} : vector<8x32xf32>, vector<32x128xf32>, vector<8x128xf32> -> vector<8x128xf32>
    %284 = arith.addf %282, %283 : vector<8x128xf32>
    %cst_73 = arith.constant 5.000000e-01 : f32
    %285 = vector.broadcast %cst_73 : f32 to vector<8x128xf32>
    %286 = arith.mulf %284, %285 : vector<8x128xf32>
    %287 = arith.select %5, %284, %286 : vector<8x128xi1>, vector<8x128xf32>
    %288 = math.tanh %287 : vector<8x128xf32>
    %cst_74 = arith.constant 5.000000e-01 : f32
    %289 = vector.broadcast %cst_74 : f32 to vector<8x128xf32>
    %290 = arith.mulf %288, %289 : vector<8x128xf32>
    %cst_75 = arith.constant 5.000000e-01 : f32
    %291 = vector.broadcast %cst_75 : f32 to vector<8x128xf32>
    %292 = arith.addf %290, %291 : vector<8x128xf32>
    %293 = arith.select %5, %288, %292 : vector<8x128xi1>, vector<8x128xf32>
    %294 = vector.extract_strided_slice %293 {offsets = [0, 0], sizes = [8, 32], strides = [1, 1]} : vector<8x128xf32> to vector<8x32xf32>
    %295 = vector.extract_strided_slice %293 {offsets = [0, 32], sizes = [8, 32], strides = [1, 1]} : vector<8x128xf32> to vector<8x32xf32>
    %296 = vector.extract_strided_slice %293 {offsets = [0, 64], sizes = [8, 32], strides = [1, 1]} : vector<8x128xf32> to vector<8x32xf32>
    %297 = vector.extract_strided_slice %293 {offsets = [0, 96], sizes = [8, 32], strides = [1, 1]} : vector<8x128xf32> to vector<8x32xf32>
    %298 = arith.mulf %295, %279 : vector<8x32xf32>
    %299 = arith.mulf %294, %296 : vector<8x32xf32>
    %300 = arith.addf %298, %299 : vector<8x32xf32>
    %301 = math.tanh %300 : vector<8x32xf32>
    %302 = arith.mulf %297, %301 : vector<8x32xf32>
    %303 = vector.extract_strided_slice %194 {offsets = [40, 0], sizes = [8, 128], strides = [1, 1]} : vector<64x128xf32> to vector<8x128xf32>
    %cst_76 = arith.constant dense<0.000000e+00> : vector<8x128xf32>
    %304 = tpu.matmul %302, %195, %cst_76 {dimension_numbers = #tpu.dot_dimension_numbers<[1], [0], [0], [1], [0, 0, 1, 1], [], []>} : vector<8x32xf32>, vector<32x128xf32>, vector<8x128xf32> -> vector<8x128xf32>
    %305 = arith.addf %303, %304 : vector<8x128xf32>
    %cst_77 = arith.constant 5.000000e-01 : f32
    %306 = vector.broadcast %cst_77 : f32 to vector<8x128xf32>
    %307 = arith.mulf %305, %306 : vector<8x128xf32>
    %308 = arith.select %5, %305, %307 : vector<8x128xi1>, vector<8x128xf32>
    %309 = math.tanh %308 : vector<8x128xf32>
    %cst_78 = arith.constant 5.000000e-01 : f32
    %310 = vector.broadcast %cst_78 : f32 to vector<8x128xf32>
    %311 = arith.mulf %309, %310 : vector<8x128xf32>
    %cst_79 = arith.constant 5.000000e-01 : f32
    %312 = vector.broadcast %cst_79 : f32 to vector<8x128xf32>
    %313 = arith.addf %311, %312 : vector<8x128xf32>
    %314 = arith.select %5, %309, %313 : vector<8x128xi1>, vector<8x128xf32>
    %315 = vector.extract_strided_slice %314 {offsets = [0, 0], sizes = [8, 32], strides = [1, 1]} : vector<8x128xf32> to vector<8x32xf32>
    %316 = vector.extract_strided_slice %314 {offsets = [0, 32], sizes = [8, 32], strides = [1, 1]} : vector<8x128xf32> to vector<8x32xf32>
    %317 = vector.extract_strided_slice %314 {offsets = [0, 64], sizes = [8, 32], strides = [1, 1]} : vector<8x128xf32> to vector<8x32xf32>
    %318 = vector.extract_strided_slice %314 {offsets = [0, 96], sizes = [8, 32], strides = [1, 1]} : vector<8x128xf32> to vector<8x32xf32>
    %319 = arith.mulf %316, %300 : vector<8x32xf32>
    %320 = arith.mulf %315, %317 : vector<8x32xf32>
    %321 = arith.addf %319, %320 : vector<8x32xf32>
    %322 = math.tanh %321 : vector<8x32xf32>
    %323 = arith.mulf %318, %322 : vector<8x32xf32>
    %324 = vector.extract_strided_slice %194 {offsets = [48, 0], sizes = [8, 128], strides = [1, 1]} : vector<64x128xf32> to vector<8x128xf32>
    %cst_80 = arith.constant dense<0.000000e+00> : vector<8x128xf32>
    %325 = tpu.matmul %323, %195, %cst_80 {dimension_numbers = #tpu.dot_dimension_numbers<[1], [0], [0], [1], [0, 0, 1, 1], [], []>} : vector<8x32xf32>, vector<32x128xf32>, vector<8x128xf32> -> vector<8x128xf32>
    %326 = arith.addf %324, %325 : vector<8x128xf32>
    %cst_81 = arith.constant 5.000000e-01 : f32
    %327 = vector.broadcast %cst_81 : f32 to vector<8x128xf32>
    %328 = arith.mulf %326, %327 : vector<8x128xf32>
    %329 = arith.select %5, %326, %328 : vector<8x128xi1>, vector<8x128xf32>
    %330 = math.tanh %329 : vector<8x128xf32>
    %cst_82 = arith.constant 5.000000e-01 : f32
    %331 = vector.broadcast %cst_82 : f32 to vector<8x128xf32>
    %332 = arith.mulf %330, %331 : vector<8x128xf32>
    %cst_83 = arith.constant 5.000000e-01 : f32
    %333 = vector.broadcast %cst_83 : f32 to vector<8x128xf32>
    %334 = arith.addf %332, %333 : vector<8x128xf32>
    %335 = arith.select %5, %330, %334 : vector<8x128xi1>, vector<8x128xf32>
    %336 = vector.extract_strided_slice %335 {offsets = [0, 0], sizes = [8, 32], strides = [1, 1]} : vector<8x128xf32> to vector<8x32xf32>
    %337 = vector.extract_strided_slice %335 {offsets = [0, 32], sizes = [8, 32], strides = [1, 1]} : vector<8x128xf32> to vector<8x32xf32>
    %338 = vector.extract_strided_slice %335 {offsets = [0, 64], sizes = [8, 32], strides = [1, 1]} : vector<8x128xf32> to vector<8x32xf32>
    %339 = vector.extract_strided_slice %335 {offsets = [0, 96], sizes = [8, 32], strides = [1, 1]} : vector<8x128xf32> to vector<8x32xf32>
    %340 = arith.mulf %337, %321 : vector<8x32xf32>
    %341 = arith.mulf %336, %338 : vector<8x32xf32>
    %342 = arith.addf %340, %341 : vector<8x32xf32>
    %343 = math.tanh %342 : vector<8x32xf32>
    %344 = arith.mulf %339, %343 : vector<8x32xf32>
    %345 = vector.extract_strided_slice %194 {offsets = [56, 0], sizes = [8, 128], strides = [1, 1]} : vector<64x128xf32> to vector<8x128xf32>
    %cst_84 = arith.constant dense<0.000000e+00> : vector<8x128xf32>
    %346 = tpu.matmul %344, %195, %cst_84 {dimension_numbers = #tpu.dot_dimension_numbers<[1], [0], [0], [1], [0, 0, 1, 1], [], []>} : vector<8x32xf32>, vector<32x128xf32>, vector<8x128xf32> -> vector<8x128xf32>
    %347 = arith.addf %345, %346 : vector<8x128xf32>
    %cst_85 = arith.constant 5.000000e-01 : f32
    %348 = vector.broadcast %cst_85 : f32 to vector<8x128xf32>
    %349 = arith.mulf %347, %348 : vector<8x128xf32>
    %350 = arith.select %5, %347, %349 : vector<8x128xi1>, vector<8x128xf32>
    %351 = math.tanh %350 : vector<8x128xf32>
    %cst_86 = arith.constant 5.000000e-01 : f32
    %352 = vector.broadcast %cst_86 : f32 to vector<8x128xf32>
    %353 = arith.mulf %351, %352 : vector<8x128xf32>
    %cst_87 = arith.constant 5.000000e-01 : f32
    %354 = vector.broadcast %cst_87 : f32 to vector<8x128xf32>
    %355 = arith.addf %353, %354 : vector<8x128xf32>
    %356 = arith.select %5, %351, %355 : vector<8x128xi1>, vector<8x128xf32>
    %357 = vector.extract_strided_slice %356 {offsets = [0, 0], sizes = [8, 32], strides = [1, 1]} : vector<8x128xf32> to vector<8x32xf32>
    %358 = vector.extract_strided_slice %356 {offsets = [0, 32], sizes = [8, 32], strides = [1, 1]} : vector<8x128xf32> to vector<8x32xf32>
    %359 = vector.extract_strided_slice %356 {offsets = [0, 64], sizes = [8, 32], strides = [1, 1]} : vector<8x128xf32> to vector<8x32xf32>
    %360 = vector.extract_strided_slice %356 {offsets = [0, 96], sizes = [8, 32], strides = [1, 1]} : vector<8x128xf32> to vector<8x32xf32>
    %361 = arith.mulf %358, %342 : vector<8x32xf32>
    %362 = arith.mulf %357, %359 : vector<8x32xf32>
    %363 = arith.addf %361, %362 : vector<8x32xf32>
    %364 = math.tanh %363 : vector<8x32xf32>
    %365 = arith.mulf %360, %364 : vector<8x32xf32>
    %c1 = arith.constant 1 : index
    %c0_88 = arith.constant 0 : index
    %c0_89 = arith.constant 0 : index
    %366 = vector.load %arg10[%c1, %c0_88, %c0_89] : memref<2x8x32xf32, #tpu.memory_space<vmem>>, vector<1x8x32xf32>
    %367 = vector.shape_cast %366 : vector<1x8x32xf32> to vector<8x32xf32>
    %368 = vector.shape_cast %365 : vector<8x32xf32> to vector<1x8x32xf32>
    tpu.vector_store %arg10[%c1, %c0_88, %c0_89], %368 {strides = array<i32>} : memref<2x8x32xf32, #tpu.memory_space<vmem>>, vector<1x8x32xf32>,
    %c1_90 = arith.constant 1 : index
    %c0_91 = arith.constant 0 : index
    %c0_92 = arith.constant 0 : index
    %369 = vector.load %arg11[%c1_90, %c0_91, %c0_92] : memref<2x8x32xf32, #tpu.memory_space<vmem>>, vector<1x8x32xf32>
    %370 = vector.shape_cast %369 : vector<1x8x32xf32> to vector<8x32xf32>
    %371 = vector.shape_cast %363 : vector<8x32xf32> to vector<1x8x32xf32>
    tpu.vector_store %arg11[%c1_90, %c0_91, %c0_92], %371 {strides = array<i32>} : memref<2x8x32xf32, #tpu.memory_space<vmem>>, vector<1x8x32xf32>,
    %372 = tpu.concatenate %218, %239, %260, %281, %302, %323, %344, %365 in 0 : vector<8x32xf32>, vector<8x32xf32>, vector<8x32xf32>, vector<8x32xf32>, vector<8x32xf32>, vector<8x32xf32>, vector<8x32xf32>, vector<8x32xf32> -> vector<64x32xf32>
    %c0_93 = arith.constant 0 : index
    %c0_94 = arith.constant 0 : index
    %373 = vector.load %arg7[%c0_93, %c0_94] : memref<32x128xf32, #tpu.memory_space<vmem>>, vector<32x128xf32>
    %cst_95 = arith.constant dense<0.000000e+00> : vector<64x128xf32>
    %374 = tpu.matmul %372, %373, %cst_95 {dimension_numbers = #tpu.dot_dimension_numbers<[1], [0], [0], [1], [0, 0, 1, 1], [], []>} : vector<64x32xf32>, vector<32x128xf32>, vector<64x128xf32> -> vector<64x128xf32>
    %c0_96 = arith.constant 0 : index
    %c0_97 = arith.constant 0 : index
    %375 = vector.load %arg8[%c0_96, %c0_97] : memref<1x128xf32, #tpu.memory_space<vmem>>, vector<1x128xf32>
    %376 = vector.broadcast %375 : vector<1x128xf32> to vector<64x128xf32>
    %377 = arith.addf %374, %376 : vector<64x128xf32>
    %c0_98 = arith.constant 0 : index
    %c0_99 = arith.constant 0 : index
    %378 = vector.load %arg9[%c0_98, %c0_99] : memref<64x128xf32, #tpu.memory_space<vmem>>, vector<64x128xf32>
    tpu.vector_store %arg9[%c0_98, %c0_99], %377 {strides = array<i32>} : memref<64x128xf32, #tpu.memory_space<vmem>>, vector<64x128xf32>,
    return
  }
}

</mosaic_0001>

<bundles_post_ra>
// kernel: rizzline_forward.1
= control target key start
LH: loop header
LB: loop body
LE: loop exit
PB: predicated region body
PF: predicated region fallthrough
CT: control target
= control target key end

     0   :  { %vm59_vm0 = vcmask 261120   ;;  %v2524_v8 = vmov 0.0   ;;  %vm2525_vm1 = vmmov 0   ;;  %v35_v16 = vlaneseq  ;;  %s2527_s26 = smov 32   ;;  %s3168_s1 = inlined_call_operand.vmem [shape: f32[32,128], index: 1, kind: input, shape index: {}]   ;;  %s3169_s0 = inlined_call_operand.vmem [shape: f32[64,32], index: 0, kind: input, shape index: {}]   ;;  %s3170_s2 = inlined_call_operand.vmem [shape: f32[32,128], index: 2, kind: input, shape index: {}]   ;;  %s3171_s3 = inlined_call_operand.vmem [shape: f32[1,128], index: 3, kind: input, shape index: {}]   ;;  %s3172_s4 = inlined_call_operand.vmem [shape: f32[32,128], index: 4, kind: input, shape index: {}]   ;;  %s3173_s5 = inlined_call_operand.vmem [shape: f32[32,128], index: 5, kind: input, shape index: {}]   ;;  %s3174_s6 = inlined_call_operand.vmem [shape: f32[1,128], index: 6, kind: input, shape index: {}]   ;;  %s3175_s10 = inlined_call_operand.vmem [shape: f32[2,8,32], index: 10, kind: output, shape index: {1}]   ;;  %s3176_s7 = inlined_call_operand.vmem [shape: f32[32,128], index: 7, kind: input, shape index: {}]   ;;  %s3177_s8 = inlined_call_operand.vmem [shape: f32[1,128], index: 8, kind: input, shape index: {}]   ;;  %s3178_s9 = inlined_call_operand.vmem [shape: f32[64,128], index: 9, kind: output, shape index: {0}]   ;;  %s3179_s11 = inlined_call_operand.vmem [shape: f32[2,8,32], index: 11, kind: output, shape index: {2}]  }
   0x1   :  { %v51_v0 = vld [vmem:[%s3168_s1 + $0x18] sm:$0xff]  ;;  %v50_v1 = vld [vmem:[%s3168_s1 + $0x10] sm:$0xff]  ;;  %v49_v2 = vld [vmem:[%s3168_s1 + $0x8] sm:$0xff] }
   0x2   :  { %2447 = vmatprep.subr.mxu1 %v51_v0  ;;  %2211 = vmatprep.subr.mxu0 %v51_v0  ;;  %v44_v3 = vld [vmem:[%s3169_s0 + $0x20] sm:$0xff]  ;;  %v45_v5 = vld [vmem:[%s3169_s0 + $0x28] sm:$0xff]  ;;  %v2611_v6 = vld [vmem:[%s3170_s2 + $0x18] sm:$0xff]  ;;  %v36_v19 = vand.u32 127, %v35_v16 }
   0x3   :  { %2451 = vmatpush3.msra.mxu1 %v51_v0  ;;  %2212 = vmatpush3.msra.mxu0 %v51_v0  ;;  %v48_v4 = vld [vmem:[%s3168_s1] sm:$0xff]  ;;  %v41_v9 = vld [vmem:[%s3169_s0 + $0x8] sm:$0xff]  ;;  %v46_v10 = vld [vmem:[%s3169_s0 + $0x30] sm:$0xff] }
   0x4   :  { %2448 = vmatprep.subr.mxu1 %v50_v1  ;;  %2213 = vmatprep.subr.mxu0 %v50_v1  ;;  %v40_v7 = vld [vmem:[%s3169_s0] sm:$0xff]  ;;  %v2628_v11 = vld [vmem:[%s3170_s2 + $0x10] sm:$0xff]  ;;  %v47_v12 = vld [vmem:[%s3169_s0 + $0x38] sm:$0xff]  ;;  %vm37_vm2 = vcmp.ge.s32.totalorder %v36_v19, 64  ;;  %vm38_vm3 = vcmp.lt.s32.totalorder %v36_v19, 96 }
   0x5   :  { %2452 = vmatpush3.msra.mxu1 %v50_v1  ;;  %2214 = vmatpush3.msra.mxu0 %v50_v1  ;;  %v2640_v13 = vld [vmem:[%s3170_s2 + $0x8] sm:$0xff]  ;;  %v2649_v14 = vld [vmem:[%s3170_s2] sm:$0xff]  ;;  %vm2690_vm4 = vmand %vm37_vm2, %vm38_vm3 }
   0x6   :  { %2449 = vmatprep.subr.mxu1 %v49_v2  ;;  %2215 = vmatprep.subr.mxu0 %v49_v2  ;;  %v2685_v22 = vld [vmem:[%s3171_s3] ss:$0 sm:$0xff]  ;;  %s2526_s3 = smov 64   ;;  %v42_v59 = vld [vmem:[%s3169_s0 + $0x10] sm:$0xff]  ;;  %v43_v60 = vld [vmem:[%s3169_s0 + $0x18] sm:$0xff] }
   0x7   :  { %2453 = vmatpush3.msra.mxu1 %v49_v2  ;;  %2225 = vmatprep.mubr.msk.f32.mxu1 %vm59_vm0, %v44_v3 }
   0x8   :  { %2450 = vmatprep.subr.mxu1 %v48_v4  ;;  %2216 = vmatpush3.msra.mxu0 %v49_v2 }
   0x9   :  { %2454 = vmatpush3.msra.mxu1 %v48_v4  ;;  %2217 = vmatprep.subr.mxu0 %v48_v4 }
   0xa   :  { %2226 = vmatmul.mubr.msk.f32.vlgmr.msra.gmra.mxu1 %vm59_vm0, %v45_v5  ;;  %2231 = vmatprep.subr.mxu1 %v2524_v8 }
   0xb   :  { %2232 = vmatpush3.msra.mxu1 %v2611_v6  ;;  %2218 = vmatpush3.msra.mxu0 %v48_v4 }
   0xc   :  { %2219 = vmatprep.mubr.msk.f32.mxu0 %vm59_vm0, %v40_v7  ;;  %2233 = vmatprep.subr.mxu1 %v2524_v8 }
   0xd   :  { %2220 = vmatmul.mubr.msk.f32.vlgmr.msra.gmra.mxu0 %vm59_vm0, %v41_v9  ;;  %2228 = vmatprep.mubr.msk.f32.mxu1 %vm59_vm0, %v46_v10 }
   0xe   :  { %2234 = vmatpush3.msra.mxu1 %v2628_v11  ;;  %2253 = vmatprep.subr.mxu0 %v2524_v8 }
   0xf   :  { %2229 = vmatmul.mubr.msk.f32.gmra.mxu1 %vm59_vm0, %v47_v12  ;;  %2235 = vmatprep.subr.mxu1 %v2524_v8 }
  0x10   :  { %2236 = vmatpush3.msra.mxu1 %v2640_v13  ;;  %2239 = vmatprep.mubr.msk.f32.mxu1 %vm2525_vm1, %v2524_v8 }
  0x11   :  { %2237 = vmatprep.subr.mxu1 %v2524_v8  ;;  %2254 = vmatpush3.msra.mxu0 %v2611_v6 }
  0x12   :  { %2238 = vmatpush3.msra.mxu1 %v2649_v14  ;;  %2255 = vmatprep.subr.mxu0 %v2524_v8 }
  0x13   :  { %2240 = vmatmul.mubr.f32.vlgmr.msra.gmra.mxu1 %v2524_v8  ;;  %2242 = vmatprep.subr.mxu1 %v2524_v8 }
  0x14   :  { %2243 = vmatpush3.msra.mxu1 %v2611_v6  ;;  %2250 = vmatprep.mubr.msk.f32.mxu1 %vm2525_vm1, %v2524_v8 }
  0x15   :  { %2244 = vmatprep.subr.mxu1 %v2524_v8  ;;  %2256 = vmatpush3.msra.mxu0 %v2628_v11 }
  0x16   :  { %2245 = vmatpush3.msra.mxu1 %v2628_v11  ;;  %2257 = vmatprep.subr.mxu0 %v2524_v8 }
  0x17   :  { %2246 = vmatprep.subr.mxu1 %v2524_v8  ;;  %2258 = vmatpush3.msra.mxu0 %v2640_v13 }
  0x18   :  { %2247 = vmatpush3.msra.mxu1 %v2640_v13  ;;  %2259 = vmatprep.subr.mxu0 %v2524_v8 }
  0x19   :  { %2248 = vmatprep.subr.mxu1 %v2524_v8  ;;  %2260 = vmatpush3.msra.mxu0 %v2649_v14 }
  0x1a   :  { %2249 = vmatpush3.msra.mxu1 %v2649_v14  ;;  %2275 = vmatprep.subr.mxu0 %v2524_v8 }
  0x1b   :  { %2264 = vmatprep.subr.mxu1 %v2524_v8  ;;  %2222 = vmatprep.mubr.msk.f32.mxu0 %vm59_vm0, %v42_v59 }
  0x1c   :  { %2223 = vmatmul.mubr.msk.f32.gmra.mxu0 %vm59_vm0, %v43_v60 }
  0x1d   :  { %2261 = vmatprep.mubr.msk.f32.mxu0 %vm2525_vm1, %v2524_v8 }
  0xca   :  { %v2676_v15 = vpop.f32.mrf.mxu1 }
  0xcc   :  { %v2678_v17 = vpop.f32.mrf.mxu1 }
  0xcd   :  { %v2221_v18 = vpop.f32.mrf.mxu0 }
  0xce   :  { %v156_v44 = vadd.f32 %v2221_v18, %v2685_v22 }
  0xcf   :  { %v2680_v20 = vpop.f32.mrf.mxu1  ;;  %v150_v21 = vpop.f32.mrf.mxu0 }
  0xd0   :  { %v151_v24 = vadd.f32 %v2685_v22, %v150_v21 }
  0xd1   :  { %v2687_v23 = vpop.f32.mrf.mxu1 }
  0xd3   :  { %v262_v25 = vpop.f32.mrf.mxu1 }
  0xd4   :  { %v266_v26 = vadd.f32 %v262_v25, %v151_v24 }
  0xd5   :  { %v2241_v28 = vpop.f32.mrf.mxu1 }
  0xd6   :  { %v267_v29 = vmul.f32 0.5, %v266_v26 }
  0xd8   :  { %v268_v30 = vsel %vm2690_vm4, %v266_v26, %v267_v29 }
  0xd9   :  { %2460 = vtanh.f32 %v268_v30 }
  0xdc   :  { %v2224_v1 = vpop.f32.mrf.mxu0 }
  0xde   :  { %v160_v2 = vpop.f32.mrf.mxu0 }
  0xdf   :  { %v161_v3 = vadd.f32 %v2685_v22, %v160_v2 }
  0xe6   :  { %v2461_v31 = vpop.eup %2460 }
  0xe7   :  { %v270_v32 = vmul.f32 0.5, %v2461_v31 }
  0xe9   :  { %v271_v33 = vadd.f32 0.5, %v270_v32 }
  0xeb   :  { %v272_v34 = vsel %vm2690_vm4, %v2461_v31, %v271_v33  ;;  %v166_v33 = vadd.f32 %v2224_v1, %v2685_v22 }
  0xec   :  { %275 = vrot.lane.b32.xlu0 %v272_v34, %s2526_s3  ;;  %v273_v37 = vmul.f32 0.0, %v272_v34 }
 0x15e   :  { %v276_v35 = vpop.permute.xlu0 %275 }
 0x15f   :  { %v278_v36 = vmul.f32 %v276_v35, %v272_v34 }
 0x161   :  { %280 = vrot.lane.b32.xlu0 %v278_v36, %s2527_s26 }
 0x1d3   :  { %v281_v38 = vpop.permute.xlu0 %280 }
 0x1d4   :  { %v283_v39 = vadd.f32 %v281_v38, %v273_v37 }
 0x1d6   :  { %2462 = vtanh.f32 %v283_v39 }
 0x1e3   :  { %v2463_v40 = vpop.eup %2462 }
 0x1e4   :  { %286 = vrot.lane.b32.xlu1 %v2463_v40, %s2526_s3 }
 0x256   :  { %v287_v41 = vpop.permute.xlu1 %286 }
 0x257   :  { %v289_v42 = vmul.f32 %v287_v41, %v272_v34 }
 0x259   :  { %291 = vrot.lane.b32.xlu1 %v289_v42, %s2527_s26 }
 0x2cb   :  { %v2702_v43 = vpop.permute.xlu1 %291 }
 0x2cc   :  { %2251 = vmatmul.mubr.msk.f32.vlgmr.msra.gmra.mxu1 %vm59_vm0, %v2702_v43 }
 0x2cd   :  { %2265 = vmatpush3.msra.mxu1 %v2611_v6  ;;  %2272 = vmatprep.mubr.msk.f32.mxu1 %vm2525_vm1, %v2524_v8 }
 0x2ce   :  { %2266 = vmatprep.subr.mxu1 %v2524_v8 }
 0x2cf   :  { %2267 = vmatpush3.msra.mxu1 %v2628_v11 }
 0x2d0   :  { %2268 = vmatprep.subr.mxu1 %v2524_v8 }
 0x2d1   :  { %2269 = vmatpush3.msra.mxu1 %v2640_v13 }
 0x2d2   :  { %2270 = vmatprep.subr.mxu1 %v2524_v8 }
 0x2d3   :  { %2271 = vmatpush3.msra.mxu1 %v2649_v14 }
 0x2d4   :  { %2286 = vmatprep.subr.mxu1 %v2524_v8 }
 0x38c   :  { %v361_v45 = vpop.f32.mrf.mxu1 }
 0x38d   :  { %v365_v46 = vadd.f32 %v361_v45, %v156_v44 }
 0x38e   :  { %v2252_v47 = vpop.f32.mrf.mxu1 }
 0x38f   :  { %v366_v48 = vmul.f32 0.5, %v365_v46 }
 0x391   :  { %v367_v49 = vsel %vm2690_vm4, %v365_v46, %v366_v48 }
 0x392   :  { %2464 = vtanh.f32 %v367_v49 }
 0x39f   :  { %v2465_v50 = vpop.eup %2464 }
 0x3a0   :  { %v369_v51 = vmul.f32 0.5, %v2465_v50 }
 0x3a2   :  { %v370_v52 = vadd.f32 0.5, %v369_v51 }
 0x3a4   :  { %v371_v53 = vsel %vm2690_vm4, %v2465_v50, %v370_v52 }
 0x3a5   :  { %374 = vrot.lane.b32.xlu0 %v371_v53, %s2526_s3  ;;  %v372_v56 = vmul.f32 %v371_v53, %v283_v39 }
 0x417   :  { %v375_v54 = vpop.permute.xlu0 %374 }
 0x418   :  { %v377_v55 = vmul.f32 %v375_v54, %v371_v53 }
 0x41a   :  { %379 = vrot.lane.b32.xlu1 %v377_v55, %s2527_s26 }
 0x48c   :  { %v380_v57 = vpop.permute.xlu1 %379 }
 0x48d   :  { %v382_v58 = vadd.f32 %v380_v57, %v372_v56 }
 0x48f   :  { %2466 = vtanh.f32 %v382_v58 }
 0x49c   :  { %v2467_v61 = vpop.eup %2466 }
 0x49d   :  { %385 = vrot.lane.b32.xlu0 %v2467_v61, %s2526_s3 }
 0x50f   :  { %v386_v62 = vpop.permute.xlu0 %385 }
 0x510   :  { %v388_v63 = vmul.f32 %v386_v62, %v371_v53  ;;  %v171_v53 = vadd.f32 %v2685_v22, %v2678_v17 }
 0x512   :  { %390 = vrot.lane.b32.xlu1 %v388_v63, %s2527_s26 }
 0x584   :  { %v2735_v0 = vpop.permute.xlu1 %390 }
 0x585   :  { %2262 = vmatmul.mubr.msk.f32.vlgmr.msra.gmra.mxu0 %vm59_vm0, %v2735_v0 }
 0x586   :  { %2276 = vmatpush3.msra.mxu0 %v2611_v6  ;;  %2283 = vmatprep.mubr.msk.f32.mxu0 %vm2525_vm1, %v2524_v8 }
 0x587   :  { %2277 = vmatprep.subr.mxu0 %v2524_v8 }
 0x588   :  { %2278 = vmatpush3.msra.mxu0 %v2628_v11 }
 0x589   :  { %2279 = vmatprep.subr.mxu0 %v2524_v8 }
 0x58a   :  { %2280 = vmatpush3.msra.mxu0 %v2640_v13 }
 0x58b   :  { %2281 = vmatprep.subr.mxu0 %v2524_v8 }
 0x58c   :  { %2282 = vmatpush3.msra.mxu0 %v2649_v14 }
 0x58d   :  { %2297 = vmatprep.subr.mxu0 %v2524_v8 }
 0x645   :  { %v460_v4 = vpop.f32.mrf.mxu0 }
 0x646   :  { %v464_v5 = vadd.f32 %v460_v4, %v161_v3 }
 0x647   :  { %v2263_v7 = vpop.f32.mrf.mxu0 }
 0x648   :  { %v465_v9 = vmul.f32 0.5, %v464_v5 }
 0x64a   :  { %v466_v10 = vsel %vm2690_vm4, %v464_v5, %v465_v9 }
 0x64b   :  { %2468 = vtanh.f32 %v466_v10 }
 0x658   :  { %v2469_v12 = vpop.eup %2468 }
 0x659   :  { %v468_v16 = vmul.f32 0.5, %v2469_v12 }
 0x65b   :  { %v469_v18 = vadd.f32 0.5, %v468_v16 }
 0x65d   :  { %v470_v19 = vsel %vm2690_vm4, %v2469_v12, %v469_v18 }
 0x65e   :  { %473 = vrot.lane.b32.xlu0 %v470_v19, %s2526_s3  ;;  %v471_v25 = vmul.f32 %v470_v19, %v382_v58 }
 0x6d0   :  { %v474_v21 = vpop.permute.xlu0 %473 }
 0x6d1   :  { %v476_v24 = vmul.f32 %v474_v21, %v470_v19 }
 0x6d3   :  { %478 = vrot.lane.b32.xlu1 %v476_v24, %s2527_s26 }
 0x745   :  { %v479_v26 = vpop.permute.xlu1 %478 }
 0x746   :  { %v481_v28 = vadd.f32 %v479_v26, %v471_v25 }
 0x748   :  { %2470 = vtanh.f32 %v481_v28 }
 0x755   :  { %v2471_v29 = vpop.eup %2470 }
 0x756   :  { %484 = vrot.lane.b32.xlu0 %v2471_v29, %s2526_s3  ;;  %v996_v29 = vld [vmem:[%s3172_s4 + $0x18] sm:$0xff] }
 0x7c8   :  { %v485_v30 = vpop.permute.xlu0 %484 }
 0x7c9   :  { %v487_v31 = vmul.f32 %v485_v30, %v470_v19 }
 0x7cb   :  { %489 = vrot.lane.b32.xlu1 %v487_v31, %s2527_s26 }
 0x83d   :  { %v2758_v32 = vpop.permute.xlu1 %489 }
 0x83e   :  { %2273 = vmatmul.mubr.msk.f32.vlgmr.msra.gmra.mxu1 %vm59_vm0, %v2758_v32 }
 0x83f   :  { %2287 = vmatpush3.msra.mxu1 %v2611_v6  ;;  %2294 = vmatprep.mubr.msk.f32.mxu1 %vm2525_vm1, %v2524_v8 }
 0x840   :  { %2288 = vmatprep.subr.mxu1 %v2524_v8 }
 0x841   :  { %2289 = vmatpush3.msra.mxu1 %v2628_v11 }
 0x842   :  { %2290 = vmatprep.subr.mxu1 %v2524_v8 }
 0x843   :  { %2291 = vmatpush3.msra.mxu1 %v2640_v13 }
 0x844   :  { %2292 = vmatprep.subr.mxu1 %v2524_v8 }
 0x845   :  { %2293 = vmatpush3.msra.mxu1 %v2649_v14 }
 0x846   :  { %2308 = vmatprep.subr.mxu1 %v2524_v8 }
 0x8fe   :  { %v559_v34 = vpop.f32.mrf.mxu1 }
 0x8ff   :  { %v563_v35 = vadd.f32 %v559_v34, %v166_v33 }
 0x900   :  { %v2274_v36 = vpop.f32.mrf.mxu1 }
 0x901   :  { %v564_v37 = vmul.f32 0.5, %v563_v35  ;;  %v994_v36 = vld [vmem:[%s3172_s4 + $0x8] sm:$0xff] }
 0x903   :  { %v565_v38 = vsel %vm2690_vm4, %v563_v35, %v564_v37  ;;  %v995_v35 = vld [vmem:[%s3172_s4 + $0x10] sm:$0xff]  ;;  %v993_v37 = vld [vmem:[%s3172_s4] sm:$0xff] }
 0x904   :  { %2472 = vtanh.f32 %v565_v38 }
 0x911   :  { %v2473_v39 = vpop.eup %2472 }
 0x912   :  { %v567_v40 = vmul.f32 0.5, %v2473_v39 }
 0x914   :  { %v568_v41 = vadd.f32 0.5, %v567_v40 }
 0x916   :  { %v569_v42 = vsel %vm2690_vm4, %v2473_v39, %v568_v41 }
 0x917   :  { %572 = vrot.lane.b32.xlu0 %v569_v42, %s2526_s3  ;;  %v570_v46 = vmul.f32 %v569_v42, %v481_v28 }
 0x989   :  { %v573_v44 = vpop.permute.xlu0 %572 }
 0x98a   :  { %v575_v45 = vmul.f32 %v573_v44, %v569_v42 }
 0x98c   :  { %577 = vrot.lane.b32.xlu1 %v575_v45, %s2527_s26 }
 0x9fe   :  { %v578_v47 = vpop.permute.xlu1 %577 }
 0x9ff   :  { %v580_v48 = vadd.f32 %v578_v47, %v570_v46 }
 0xa01   :  { %2474 = vtanh.f32 %v580_v48 }
 0xa0e   :  { %v2475_v49 = vpop.eup %2474 }
 0xa0f   :  { %583 = vrot.lane.b32.xlu0 %v2475_v49, %s2526_s3 }
 0xa81   :  { %v584_v50 = vpop.permute.xlu0 %583 }
 0xa82   :  { %v586_v51 = vmul.f32 %v584_v50, %v569_v42 }
 0xa84   :  { %588 = vrot.lane.b32.xlu1 %v586_v51, %s2527_s26  ;;  %v2864_v51 = vld [vmem:[%s3173_s5 + $0x18] sm:$0xff] }
 0xaf6   :  { %v2781_v52 = vpop.permute.xlu1 %588 }
 0xaf7   :  { %2284 = vmatmul.mubr.msk.f32.vlgmr.msra.gmra.mxu0 %vm59_vm0, %v2781_v52 }
 0xaf8   :  { %2298 = vmatpush3.msra.mxu0 %v2611_v6  ;;  %2305 = vmatprep.mubr.msk.f32.mxu0 %vm2525_vm1, %v2524_v8 }
 0xaf9   :  { %2299 = vmatprep.subr.mxu0 %v2524_v8 }
 0xafa   :  { %2300 = vmatpush3.msra.mxu0 %v2628_v11 }
 0xafb   :  { %2301 = vmatprep.subr.mxu0 %v2524_v8 }
 0xafc   :  { %2302 = vmatpush3.msra.mxu0 %v2640_v13 }
 0xafd   :  { %2303 = vmatprep.subr.mxu0 %v2524_v8 }
 0xafe   :  { %2304 = vmatpush3.msra.mxu0 %v2649_v14 }
 0xaff   :  { %2319 = vmatprep.subr.mxu0 %v996_v29 }
 0xbb7   :  { %v658_v54 = vpop.f32.mrf.mxu0 }
 0xbb8   :  { %v662_v55 = vadd.f32 %v658_v54, %v171_v53  ;;  %v2877_v53 = vld [vmem:[%s3173_s5 + $0x8] sm:$0xff]  ;;  %v2884_v54 = vld [vmem:[%s3173_s5] sm:$0xff] }
 0xbb9   :  { %v2285_v56 = vpop.f32.mrf.mxu0 }
 0xbba   :  { %v663_v57 = vmul.f32 0.5, %v662_v55 }
 0xbbc   :  { %v664_v58 = vsel %vm2690_vm4, %v662_v55, %v663_v57 }
 0xbbd   :  { %2476 = vtanh.f32 %v664_v58  ;;  %v186_v58 = vadd.f32 %v2680_v20, %v2685_v22 }
 0xbca   :  { %v2477_v59 = vpop.eup %2476 }
 0xbcb   :  { %v666_v60 = vmul.f32 0.5, %v2477_v59 }
 0xbcd   :  { %v667_v61 = vadd.f32 0.5, %v666_v60 }
 0xbcf   :  { %v668_v62 = vsel %vm2690_vm4, %v2477_v59, %v667_v61 }
 0xbd0   :  { %671 = vrot.lane.b32.xlu0 %v668_v62, %s2526_s3  ;;  %v669_v17 = vmul.f32 %v668_v62, %v580_v48 }
 0xc42   :  { %v672_v63 = vpop.permute.xlu0 %671 }
 0xc43   :  { %v674_v1 = vmul.f32 %v672_v63, %v668_v62 }
 0xc45   :  { %676 = vrot.lane.b32.xlu1 %v674_v1, %s2527_s26  ;;  %v2918_v1 = vld [vmem:[%s3174_s6] ss:$0 sm:$0xff] }
 0xcb7   :  { %v677_v2 = vpop.permute.xlu1 %676 }
 0xcb8   :  { %v679_v3 = vadd.f32 %v677_v2, %v669_v17 }
 0xcba   :  { %2478 = vtanh.f32 %v679_v3 }
 0xcc7   :  { %v2479_v4 = vpop.eup %2478 }
 0xcc8   :  { %682 = vrot.lane.b32.xlu0 %v2479_v4, %s2526_s3 }
 0xd3a   :  { %v683_v5 = vpop.permute.xlu0 %682 }
 0xd3b   :  { %v685_v7 = vmul.f32 %v683_v5, %v668_v62 }
 0xd3d   :  { %687 = vrot.lane.b32.xlu1 %v685_v7, %s2527_s26 }
 0xdaf   :  { %v688_v9 = vpop.permute.xlu1 %687 }
 0xdb0   :  { %2295 = vmatmul.mubr.msk.f32.vlgmr.msra.gmra.mxu1 %vm59_vm0, %v688_v9 }
 0xdb1   :  { %2309 = vmatpush3.msra.mxu1 %v2611_v6  ;;  %2316 = vmatprep.mubr.msk.f32.mxu1 %vm2525_vm1, %v2524_v8  ;;  %v176_v6 = vadd.f32 %v2676_v15, %v2685_v22 }
 0xdb2   :  { %2310 = vmatprep.subr.mxu1 %v2524_v8 }
 0xdb3   :  { %2311 = vmatpush3.msra.mxu1 %v2628_v11 }
 0xdb4   :  { %2312 = vmatprep.subr.mxu1 %v2524_v8 }
 0xdb5   :  { %2313 = vmatpush3.msra.mxu1 %v2640_v13 }
 0xdb6   :  { %2314 = vmatprep.subr.mxu1 %v2524_v8 }
 0xdb7   :  { %2315 = vmatpush3.msra.mxu1 %v2649_v14 }
 0xdb8   :  { %2339 = vmatprep.subr.mxu1 %v2524_v8 }
 0xe70   :  { %v757_v10 = vpop.f32.mrf.mxu1 }
 0xe71   :  { %v761_v12 = vadd.f32 %v757_v10, %v176_v6 }
 0xe72   :  { %v2296_v16 = vpop.f32.mrf.mxu1 }
 0xe73   :  { %v762_v18 = vmul.f32 0.5, %v761_v12 }
 0xe75   :  { %v763_v11 = vsel %vm2690_vm4, %v761_v12, %v762_v18 }
 0xe76   :  { %2480 = vtanh.f32 %v763_v11 }
 0xe83   :  { %v2481_v19 = vpop.eup %2480 }
 0xe84   :  { %v765_v21 = vmul.f32 0.5, %v2481_v19 }
 0xe86   :  { %v766_v13 = vadd.f32 0.5, %v765_v21 }
 0xe88   :  { %v767_v24 = vsel %vm2690_vm4, %v2481_v19, %v766_v13 }
 0xe89   :  { %770 = vrot.lane.b32.xlu0 %v767_v24, %s2526_s3  ;;  %v768_v15 = vmul.f32 %v767_v24, %v679_v3 }
 0xefb   :  { %v771_v14 = vpop.permute.xlu0 %770 }
 0xefc   :  { %v773_v25 = vmul.f32 %v771_v14, %v767_v24 }
 0xefe   :  { %775 = vrot.lane.b32.xlu1 %v773_v25, %s2527_s26 }
 0xf70   :  { %v776_v26 = vpop.permute.xlu1 %775 }
 0xf71   :  { %v778_v28 = vadd.f32 %v776_v26, %v768_v15 }
 0xf73   :  { %2482 = vtanh.f32 %v778_v28 }
 0xf80   :  { %v2483_v30 = vpop.eup %2482 }
 0xf81   :  { %781 = vrot.lane.b32.xlu0 %v2483_v30, %s2526_s3 }
 0xff3   :  { %v782_v31 = vpop.permute.xlu0 %781 }
 0xff4   :  { %v784_v33 = vmul.f32 %v782_v31, %v767_v24 }
 0xff6   :  { %786 = vrot.lane.b32.xlu1 %v784_v33, %s2527_s26 }
0x1068   :  { %v787_v34 = vpop.permute.xlu1 %786 }
0x1069   :  { %2306 = vmatmul.mubr.msk.f32.vlgmr.msra.gmra.mxu0 %vm59_vm0, %v787_v34 }
0x106a   :  { %2320 = vmatpush3.msra.mxu0 %v996_v29  ;;  %2327 = vmatprep.mubr.msk.f32.mxu0 %vm59_vm0, %v2702_v43  ;;  %v181_v43 = vadd.f32 %v2685_v22, %v2687_v23 }
0x106b   :  { %2321 = vmatprep.subr.mxu0 %v995_v35 }
0x106c   :  { %2322 = vmatpush3.msra.mxu0 %v995_v35 }
0x106d   :  { %2323 = vmatprep.subr.mxu0 %v994_v36 }
0x106e   :  { %2324 = vmatpush3.msra.mxu0 %v994_v36 }
0x106f   :  { %2325 = vmatprep.subr.mxu0 %v993_v37 }
0x1070   :  { %2326 = vmatpush3.msra.mxu0 %v993_v37 }
0x1071   :  { %2328 = vmatmul.mubr.msk.f32.vlgmr.msra.gmra.mxu0 %vm59_vm0, %v2735_v0  ;;  %2361 = vmatprep.subr.mxu0 %v2524_v8 }
0x1072   :  { %2330 = vmatprep.mubr.msk.f32.mxu0 %vm59_vm0, %v2758_v32  ;;  %2362 = vmatpush3.msra.mxu0 %v2864_v51 }
0x1073   :  { %2363 = vmatprep.subr.mxu0 %v2524_v8 }
0x1075   :  { %2331 = vmatmul.mubr.msk.f32.gmra.mxu0 %vm59_vm0, %v2781_v52  ;;  %v2870_v52 = vld [vmem:[%s3173_s5 + $0x10] sm:$0xff]  ;;  %s2528_s5 = smov 96  }
0x1076   :  { %2333 = vmatprep.mubr.msk.f32.mxu0 %vm59_vm0, %v688_v9  ;;  %2364 = vmatpush3.msra.mxu0 %v2870_v52 }
0x1077   :  { %2365 = vmatprep.subr.mxu0 %v2524_v8 }
0x1078   :  { %2366 = vmatpush3.msra.mxu0 %v2877_v53 }
0x1079   :  { %2334 = vmatmul.mubr.msk.f32.gmra.mxu0 %vm59_vm0, %v787_v34  ;;  %2367 = vmatprep.subr.mxu0 %v2524_v8 }
0x107a   :  { %2368 = vmatpush3.msra.mxu0 %v2884_v54 }
0x107b   :  { %2383 = vmatprep.subr.mxu0 %v2524_v8 }
0x1129   :  { %v856_v38 = vpop.f32.mrf.mxu0 }
0x112a   :  { %v860_v39 = vadd.f32 %v856_v38, %v181_v43 }
0x112b   :  { %v2307_v40 = vpop.f32.mrf.mxu0 }
0x112c   :  { %v861_v41 = vmul.f32 0.5, %v860_v39 }
0x112e   :  { %v862_v0 = vsel %vm2690_vm4, %v860_v39, %v861_v41 }
0x112f   :  { %2484 = vtanh.f32 %v862_v0 }
0x1131   :  { %v2329_v59 = vpop.f32.mrf.mxu0 }
0x1132   :  { %v1078_v38 = vadd.f32 %v2329_v59, %v2918_v1 }
0x1133   :  { %v1072_v63 = vpop.f32.mrf.mxu0 }
0x1134   :  { %v1073_v17 = vadd.f32 %v2918_v1, %v1072_v63 }
0x113c   :  { %v2485_v42 = vpop.eup %2484 }
0x113d   :  { %v864_v32 = vmul.f32 0.5, %v2485_v42 }
0x113f   :  { %v865_v44 = vadd.f32 0.5, %v864_v32 }
0x1141   :  { %v866_v45 = vsel %vm2690_vm4, %v2485_v42, %v865_v44 }
0x1142   :  { %869 = vrot.lane.b32.xlu0 %v866_v45, %s2526_s3  ;;  %v867_v23 = vmul.f32 %v866_v45, %v778_v28 }
0x11b4   :  { %v870_v46 = vpop.permute.xlu0 %869 }
0x11b5   :  { %v872_v47 = vmul.f32 %v870_v46, %v866_v45 }
0x11b7   :  { %874 = vrot.lane.b32.xlu1 %v872_v47, %s2527_s26 }
0x1229   :  { %v875_v48 = vpop.permute.xlu1 %874 }
0x122a   :  { %v2857_v49 = vadd.f32 %v875_v48, %v867_v23 }
0x122c   :  { %2486 = vtanh.f32 %v2857_v49 }
0x1239   :  { %v2487_v50 = vpop.eup %2486 }
0x123a   :  { %880 = vrot.lane.b32.xlu0 %v2487_v50, %s2526_s3 }
0x12ac   :  { %v881_v55 = vpop.permute.xlu0 %880 }
0x12ad   :  { %v883_v56 = vmul.f32 %v881_v55, %v866_v45 }
0x12af   :  { %885 = vrot.lane.b32.xlu1 %v883_v56, %s2527_s26 }
0x1321   :  { %v886_v57 = vpop.permute.xlu1 %885 }
0x1322   :  { %2317 = vmatmul.mubr.msk.f32.vlgmr.msra.gmra.mxu1 %vm59_vm0, %v886_v57  ;;  %2336 = vmatprep.mubr.msk.f32.mxu0 %vm59_vm0, %v886_v57 }
0x1323   :  { %2340 = vmatpush3.msra.mxu1 %v2864_v51  ;;  %2347 = vmatprep.mubr.msk.f32.mxu1 %vm2525_vm1, %v2524_v8 }
0x1324   :  { %2341 = vmatprep.subr.mxu1 %v2524_v8 }
0x1325   :  { %2342 = vmatpush3.msra.mxu1 %v2870_v52 }
0x1326   :  { %2343 = vmatprep.subr.mxu1 %v2524_v8 }
0x1327   :  { %2344 = vmatpush3.msra.mxu1 %v2877_v53 }
0x1328   :  { %2345 = vmatprep.subr.mxu1 %v2524_v8 }
0x1329   :  { %2346 = vmatpush3.msra.mxu1 %v2884_v54 }
0x132a   :  { %2348 = vmatmul.mubr.f32.vlgmr.msra.gmra.mxu1 %v2524_v8  ;;  %2350 = vmatprep.subr.mxu1 %v2524_v8 }
0x132b   :  { %2351 = vmatpush3.msra.mxu1 %v2864_v51  ;;  %2358 = vmatprep.mubr.msk.f32.mxu1 %vm2525_vm1, %v2524_v8 }
0x132c   :  { %2352 = vmatprep.subr.mxu1 %v2524_v8 }
0x132d   :  { %2353 = vmatpush3.msra.mxu1 %v2870_v52 }
0x132e   :  { %2354 = vmatprep.subr.mxu1 %v2524_v8 }
0x132f   :  { %2355 = vmatpush3.msra.mxu1 %v2877_v53 }
0x1330   :  { %2356 = vmatprep.subr.mxu1 %v2524_v8 }
0x1331   :  { %2357 = vmatpush3.msra.mxu1 %v2884_v54 }
0x1332   :  { %2372 = vmatprep.subr.mxu1 %v2524_v8 }
0x13e2   :  { %v955_v60 = vpop.f32.mrf.mxu1 }
0x13e3   :  { %v959_v61 = vadd.f32 %v955_v60, %v186_v58  ;;  %v2332_v60 = vpop.f32.mrf.mxu0 }
0x13e4   :  { %v2318_v62 = vpop.f32.mrf.mxu1 }
0x13e5   :  { %v960_v16 = vmul.f32 0.5, %v959_v61 }
0x13e7   :  { %v961_v18 = vsel %vm2690_vm4, %v959_v61, %v960_v16  ;;  %v1082_v61 = vpop.f32.mrf.mxu0 }
0x13e9   :  { %v2985_v62 = vpop.f32.mrf.mxu0 }
0x13ea   :  { %v1181_v2 = vpop.f32.mrf.mxu1 }
0x13eb   :  { %v1185_v3 = vadd.f32 %v1181_v2, %v1073_v17  ;;  %v2987_v63 = vpop.f32.mrf.mxu0 }
0x13ec   :  { %v2349_v4 = vpop.f32.mrf.mxu1 }
0x13ed   :  { %v1186_v5 = vmul.f32 0.5, %v1185_v3 }
0x13ef   :  { %v1187_v7 = vsel %vm2690_vm4, %v1185_v3, %v1186_v5  ;;  %v1083_v3 = vadd.f32 %v2918_v1, %v1082_v61 }
0x13f0   :  { %2488 = vtanh.f32 %v1187_v7 }
0x13f1   :  { %2490 = vtanh.f32 %v961_v18 }
0x13fd   :  { %v2489_v20 = vpop.eup %2488 }
0x13fe   :  { %v1189_v22 = vmul.f32 0.5, %v2489_v20  ;;  %v2491_v13 = vpop.eup %2490 }
0x13ff   :  { %v963_v24 = vmul.f32 0.5, %v2491_v13 }
0x1400   :  { %v1190_v9 = vadd.f32 0.5, %v1189_v22 }
0x1401   :  { %v964_v25 = vadd.f32 0.5, %v963_v24 }
0x1402   :  { %v1191_v6 = vsel %vm2690_vm4, %v2489_v20, %v1190_v9 }
0x1403   :  { %1194 = vrot.lane.b32.xlu0 %v1191_v6, %s2526_s3  ;;  %v1192_v11 = vmul.f32 0.0, %v1191_v6  ;;  %v965_v15 = vsel %vm2690_vm4, %v2491_v13, %v964_v25 }
0x1404   :  { %v966_v33 = vmul.f32 %v965_v15, %v2857_v49 }
0x1475   :  { %v1195_v10 = vpop.permute.xlu0 %1194 }
0x1476   :  { %v1197_v12 = vmul.f32 %v1195_v10, %v1191_v6 }
0x1478   :  { %1199 = vrot.lane.b32.xlu1 %v1197_v12, %s2527_s26 }
0x14ea   :  { %v1200_v19 = vpop.permute.xlu1 %1199 }
0x14eb   :  { %v1202_v21 = vadd.f32 %v1200_v19, %v1192_v11 }
0x14ed   :  { %2492 = vtanh.f32 %v1202_v21 }
0x14fa   :  { %v2493_v14 = vpop.eup %2492 }
0x14fb   :  { %1205 = vrot.lane.b32.xlu0 %v2493_v14, %s2526_s3 }
0x14ff   :  { %968 = vrot.lane.b32.xlu0 %v965_v15, %s2526_s3 }
0x156d   :  { %v1206_v26 = vpop.permute.xlu0 %1205 }
0x156e   :  { %v1208_v28 = vmul.f32 %v1206_v26, %v1191_v6 }
0x1570   :  { %1210 = vrot.lane.b32.xlu1 %v1208_v28, %s2527_s26 }
0x1571   :  { %v969_v29 = vpop.permute.xlu0 %968 }
0x1572   :  { %v971_v30 = vmul.f32 %v969_v29, %v965_v15 }
0x1574   :  { %973 = vrot.lane.b32.xlu0 %v971_v30, %s2527_s26 }
0x15e2   :  { %v2935_v31 = vpop.permute.xlu1 %1210 }
0x15e3   :  { %2359 = vmatmul.mubr.msk.f32.vlgmr.msra.gmra.mxu1 %vm59_vm0, %v2935_v31 }
0x15e4   :  { %2373 = vmatpush3.msra.mxu1 %v2864_v51  ;;  %2380 = vmatprep.mubr.msk.f32.mxu1 %vm2525_vm1, %v2524_v8 }
0x15e5   :  { %2374 = vmatprep.subr.mxu1 %v2524_v8 }
0x15e6   :  { %v974_v34 = vpop.permute.xlu0 %973  ;;  %2375 = vmatpush3.msra.mxu1 %v2870_v52 }
0x15e7   :  { %v2945_v35 = vadd.f32 %v974_v34, %v966_v33  ;;  %2376 = vmatprep.subr.mxu1 %v2524_v8 }
0x15e8   :  { %2377 = vmatpush3.msra.mxu1 %v2877_v53 }
0x15e9   :  { %2494 = vtanh.f32 %v2945_v35  ;;  %2378 = vmatprep.subr.mxu1 %v2524_v8 }
0x15ea   :  { %2379 = vmatpush3.msra.mxu1 %v2884_v54 }
0x15eb   :  { %2394 = vmatprep.subr.mxu1 %v2524_v8 }
0x15f6   :  { %v2495_v36 = vpop.eup %2494 }
0x15f7   :  { %979 = vrot.lane.b32.xlu0 %v2495_v36, %s2526_s3 }
0x1669   :  { %v980_v37 = vpop.permute.xlu0 %979 }
0x166a   :  { %v982_v43 = vmul.f32 %v980_v37, %v965_v15  ;;  %v1088_v15 = vadd.f32 %v2332_v60, %v2918_v1 }
0x166c   :  { %984 = vrot.lane.b32.xlu0 %v982_v43, %s2527_s26 }
0x16a3   :  { %v1280_v39 = vpop.f32.mrf.mxu1 }
0x16a4   :  { %v1284_v40 = vadd.f32 %v1280_v39, %v1078_v38 }
0x16a5   :  { %v2360_v41 = vpop.f32.mrf.mxu1 }
0x16a6   :  { %v1285_v0 = vmul.f32 0.5, %v1284_v40 }
0x16a8   :  { %v1286_v42 = vsel %vm2690_vm4, %v1284_v40, %v1285_v0 }
0x16a9   :  { %2496 = vtanh.f32 %v1286_v42 }
0x16b6   :  { %v2497_v32 = vpop.eup %2496 }
0x16b7   :  { %v1288_v44 = vmul.f32 0.5, %v2497_v32 }
0x16b9   :  { %v1289_v45 = vadd.f32 0.5, %v1288_v44 }
0x16bb   :  { %v1290_v46 = vsel %vm2690_vm4, %v2497_v32, %v1289_v45 }
0x16bc   :  { %1293 = vrot.lane.b32.xlu1 %v1290_v46, %s2526_s3  ;;  %v1291_v49 = vmul.f32 %v1290_v46, %v1202_v21 }
0x16de   :  { %v985_v47 = vpop.permute.xlu0 %984 }
0x16df   :  { %987 = vst.msk [vmem:[%s3175_s10] sm:$0xff] %vm59_vm0, %v985_v47  ;;  %2337 = vmatmul.mubr.msk.f32.gmra.mxu0 %vm59_vm0, %v985_v47 }
0x16e0   :  { %2369 = vmatprep.mubr.msk.f32.mxu0 %vm2525_vm1, %v2524_v8 }
0x172e   :  { %v1294_v23 = vpop.permute.xlu1 %1293 }
0x172f   :  { %v1296_v48 = vmul.f32 %v1294_v23, %v1290_v46 }
0x1731   :  { %1298 = vrot.lane.b32.xlu1 %v1296_v48, %s2527_s26 }
0x179f   :  { %v2989_v17 = vpop.f32.mrf.mxu0 }
0x17a1   :  { %v2991_v2 = vpop.f32.mrf.mxu0 }
0x17a3   :  { %v1299_v50 = vpop.permute.xlu1 %1298 }
0x17a4   :  { %v1301_v55 = vadd.f32 %v1299_v50, %v1291_v49 }
0x17a6   :  { %2498 = vtanh.f32 %v1301_v55 }
0x17b3   :  { %v2499_v56 = vpop.eup %2498 }
0x17b4   :  { %1304 = vrot.lane.b32.xlu1 %v2499_v56, %s2526_s3 }
0x1826   :  { %v1305_v57 = vpop.permute.xlu1 %1304 }
0x1827   :  { %v1307_v58 = vmul.f32 %v1305_v57, %v1290_v46  ;;  %v1093_v46 = vadd.f32 %v2918_v1, %v2987_v63 }
0x1829   :  { %1309 = vrot.lane.b32.xlu1 %v1307_v58, %s2527_s26 }
0x189b   :  { %v2971_v59 = vpop.permute.xlu1 %1309 }
0x189c   :  { %2370 = vmatmul.mubr.msk.f32.vlgmr.msra.gmra.mxu0 %vm59_vm0, %v2971_v59 }
0x189d   :  { %2384 = vmatpush3.msra.mxu0 %v2864_v51  ;;  %2391 = vmatprep.mubr.msk.f32.mxu0 %vm2525_vm1, %v2524_v8 }
0x189e   :  { %2385 = vmatprep.subr.mxu0 %v2524_v8 }
0x189f   :  { %2386 = vmatpush3.msra.mxu0 %v2870_v52 }
0x18a0   :  { %2387 = vmatprep.subr.mxu0 %v2524_v8 }
0x18a1   :  { %2388 = vmatpush3.msra.mxu0 %v2877_v53 }
0x18a2   :  { %2389 = vmatprep.subr.mxu0 %v2524_v8 }
0x18a3   :  { %2390 = vmatpush3.msra.mxu0 %v2884_v54 }
0x18a4   :  { %2405 = vmatprep.subr.mxu0 %v2524_v8 }
0x195c   :  { %v1379_v4 = vpop.f32.mrf.mxu0 }
0x195d   :  { %v1383_v5 = vadd.f32 %v1379_v4, %v1083_v3 }
0x195e   :  { %v2371_v7 = vpop.f32.mrf.mxu0 }
0x195f   :  { %v1384_v20 = vmul.f32 0.5, %v1383_v5 }
0x1961   :  { %v1385_v22 = vsel %vm2690_vm4, %v1383_v5, %v1384_v20 }
0x1962   :  { %2500 = vtanh.f32 %v1385_v22 }
0x196f   :  { %v2501_v9 = vpop.eup %2500 }
0x1970   :  { %v1387_v6 = vmul.f32 0.5, %v2501_v9 }
0x1972   :  { %v1388_v10 = vadd.f32 0.5, %v1387_v6 }
0x1974   :  { %v1389_v12 = vsel %vm2690_vm4, %v2501_v9, %v1388_v10  ;;  %v1098_v9 = vadd.f32 %v2985_v62, %v2918_v1 }
0x1975   :  { %1392 = vrot.lane.b32.xlu0 %v1389_v12, %s2526_s3  ;;  %v1390_v11 = vmul.f32 %v1389_v12, %v1301_v55 }
0x19e7   :  { %v1393_v16 = vpop.permute.xlu0 %1392 }
0x19e8   :  { %v1395_v18 = vmul.f32 %v1393_v16, %v1389_v12 }
0x19ea   :  { %1397 = vrot.lane.b32.xlu1 %v1395_v18, %s2527_s26 }
0x1a5c   :  { %v1398_v19 = vpop.permute.xlu1 %1397 }
0x1a5d   :  { %v1400_v21 = vadd.f32 %v1398_v19, %v1390_v11 }
0x1a5f   :  { %2502 = vtanh.f32 %v1400_v21 }
0x1a6c   :  { %v2503_v13 = vpop.eup %2502 }
0x1a6d   :  { %1403 = vrot.lane.b32.xlu0 %v2503_v13, %s2526_s3  ;;  %v1917_v13 = vld [vmem:[%s3176_s7 + $0x18] sm:$0xff] }
0x1adf   :  { %v1404_v24 = vpop.permute.xlu0 %1403 }
0x1ae0   :  { %v1406_v14 = vmul.f32 %v1404_v24, %v1389_v12 }
0x1ae2   :  { %1408 = vrot.lane.b32.xlu1 %v1406_v14, %s2527_s26 }
0x1b54   :  { %v3002_v25 = vpop.permute.xlu1 %1408 }
0x1b55   :  { %2381 = vmatmul.mubr.msk.f32.vlgmr.msra.gmra.mxu1 %vm59_vm0, %v3002_v25 }
0x1b56   :  { %2395 = vmatpush3.msra.mxu1 %v2864_v51  ;;  %2402 = vmatprep.mubr.msk.f32.mxu1 %vm2525_vm1, %v2524_v8 }
0x1b57   :  { %2396 = vmatprep.subr.mxu1 %v2524_v8 }
0x1b58   :  { %2397 = vmatpush3.msra.mxu1 %v2870_v52 }
0x1b59   :  { %2398 = vmatprep.subr.mxu1 %v2524_v8 }
0x1b5a   :  { %2399 = vmatpush3.msra.mxu1 %v2877_v53 }
0x1b5b   :  { %2400 = vmatprep.subr.mxu1 %v2524_v8 }
0x1b5c   :  { %2401 = vmatpush3.msra.mxu1 %v2884_v54 }
0x1b5d   :  { %2416 = vmatprep.subr.mxu1 %v2524_v8 }
0x1c15   :  { %v1478_v26 = vpop.f32.mrf.mxu1 }
0x1c16   :  { %v1482_v28 = vadd.f32 %v1478_v26, %v1088_v15 }
0x1c17   :  { %v2382_v29 = vpop.f32.mrf.mxu1 }
0x1c18   :  { %v1483_v30 = vmul.f32 0.5, %v1482_v28  ;;  %v1915_v29 = vld [vmem:[%s3176_s7 + $0x8] sm:$0xff] }
0x1c1a   :  { %v1484_v33 = vsel %vm2690_vm4, %v1482_v28, %v1483_v30  ;;  %v1916_v28 = vld [vmem:[%s3176_s7 + $0x10] sm:$0xff]  ;;  %v1914_v30 = vld [vmem:[%s3176_s7] sm:$0xff] }
0x1c1b   :  { %2504 = vtanh.f32 %v1484_v33 }
0x1c28   :  { %v2505_v34 = vpop.eup %2504 }
0x1c29   :  { %v1486_v36 = vmul.f32 0.5, %v2505_v34 }
0x1c2b   :  { %v1487_v37 = vadd.f32 0.5, %v1486_v36 }
0x1c2d   :  { %v1488_v43 = vsel %vm2690_vm4, %v2505_v34, %v1487_v37 }
0x1c2e   :  { %1491 = vrot.lane.b32.xlu0 %v1488_v43, %s2526_s3  ;;  %v1489_v40 = vmul.f32 %v1488_v43, %v1400_v21 }
0x1ca0   :  { %v1492_v38 = vpop.permute.xlu0 %1491 }
0x1ca1   :  { %v1494_v39 = vmul.f32 %v1492_v38, %v1488_v43 }
0x1ca3   :  { %1496 = vrot.lane.b32.xlu1 %v1494_v39, %s2527_s26 }
0x1d15   :  { %v1497_v41 = vpop.permute.xlu1 %1496 }
0x1d16   :  { %v1499_v0 = vadd.f32 %v1497_v41, %v1489_v40 }
0x1d18   :  { %2506 = vtanh.f32 %v1499_v0 }
0x1d25   :  { %v2507_v42 = vpop.eup %2506 }
0x1d26   :  { %1502 = vrot.lane.b32.xlu0 %v2507_v42, %s2526_s3 }
0x1d98   :  { %v1503_v32 = vpop.permute.xlu0 %1502 }
0x1d99   :  { %v1505_v44 = vmul.f32 %v1503_v32, %v1488_v43 }
0x1d9b   :  { %1507 = vrot.lane.b32.xlu1 %v1505_v44, %s2527_s26 }
0x1e0d   :  { %v3025_v45 = vpop.permute.xlu1 %1507 }
0x1e0e   :  { %2392 = vmatmul.mubr.msk.f32.vlgmr.msra.gmra.mxu0 %vm59_vm0, %v3025_v45 }
0x1e0f   :  { %2406 = vmatpush3.msra.mxu0 %v2864_v51  ;;  %2413 = vmatprep.mubr.msk.f32.mxu0 %vm2525_vm1, %v2524_v8 }
0x1e10   :  { %2407 = vmatprep.subr.mxu0 %v2524_v8 }
0x1e11   :  { %2408 = vmatpush3.msra.mxu0 %v2870_v52 }
0x1e12   :  { %2409 = vmatprep.subr.mxu0 %v2524_v8 }
0x1e13   :  { %2410 = vmatpush3.msra.mxu0 %v2877_v53 }
0x1e14   :  { %2411 = vmatprep.subr.mxu0 %v2524_v8 }
0x1e15   :  { %2412 = vmatpush3.msra.mxu0 %v2884_v54 }
0x1e16   :  { %2427 = vmatprep.subr.mxu0 %v1917_v13 }
0x1ece   :  { %v1577_v47 = vpop.f32.mrf.mxu0 }
0x1ecf   :  { %v1581_v23 = vadd.f32 %v1577_v47, %v1093_v46 }
0x1ed0   :  { %v2393_v48 = vpop.f32.mrf.mxu0 }
0x1ed1   :  { %v1582_v49 = vmul.f32 0.5, %v1581_v23 }
0x1ed3   :  { %v1583_v50 = vsel %vm2690_vm4, %v1581_v23, %v1582_v49 }
0x1ed4   :  { %2508 = vtanh.f32 %v1583_v50 }
0x1ee1   :  { %v2509_v55 = vpop.eup %2508 }
0x1ee2   :  { %v1585_v56 = vmul.f32 0.5, %v2509_v55 }
0x1ee4   :  { %v1586_v57 = vadd.f32 0.5, %v1585_v56 }
0x1ee6   :  { %v1587_v58 = vsel %vm2690_vm4, %v2509_v55, %v1586_v57 }
0x1ee7   :  { %1590 = vrot.lane.b32.xlu0 %v1587_v58, %s2526_s3  ;;  %v1588_v63 = vmul.f32 %v1587_v58, %v1499_v0 }
0x1f59   :  { %v1591_v60 = vpop.permute.xlu0 %1590 }
0x1f5a   :  { %v1593_v61 = vmul.f32 %v1591_v60, %v1587_v58 }
0x1f5c   :  { %1595 = vrot.lane.b32.xlu1 %v1593_v61, %s2527_s26 }
0x1fce   :  { %v1596_v3 = vpop.permute.xlu1 %1595 }
0x1fcf   :  { %v1598_v4 = vadd.f32 %v1596_v3, %v1588_v63 }
0x1fd1   :  { %2510 = vtanh.f32 %v1598_v4 }
0x1fde   :  { %v2511_v5 = vpop.eup %2510 }
0x1fdf   :  { %1601 = vrot.lane.b32.xlu0 %v2511_v5, %s2526_s3 }
0x2051   :  { %v1602_v7 = vpop.permute.xlu0 %1601 }
0x2052   :  { %v1604_v20 = vmul.f32 %v1602_v7, %v1587_v58 }
0x2054   :  { %1606 = vrot.lane.b32.xlu1 %v1604_v20, %s2527_s26 }
0x20c6   :  { %v1607_v22 = vpop.permute.xlu1 %1606 }
0x20c7   :  { %2403 = vmatmul.mubr.msk.f32.vlgmr.msra.gmra.mxu1 %vm59_vm0, %v1607_v22 }
0x20c8   :  { %2417 = vmatpush3.msra.mxu1 %v2864_v51  ;;  %2424 = vmatprep.mubr.msk.f32.mxu1 %vm2525_vm1, %v2524_v8 }
0x20c9   :  { %2418 = vmatprep.subr.mxu1 %v2524_v8 }
0x20ca   :  { %2419 = vmatpush3.msra.mxu1 %v2870_v52 }
0x20cb   :  { %2420 = vmatprep.subr.mxu1 %v2524_v8 }
0x20cc   :  { %2421 = vmatpush3.msra.mxu1 %v2877_v53 }
0x20cd   :  { %2422 = vmatprep.subr.mxu1 %v2524_v8 }
0x20ce   :  { %2423 = vmatpush3.msra.mxu1 %v2884_v54 }
0x2187   :  { %v1676_v6 = vpop.f32.mrf.mxu1 }
0x2188   :  { %v1680_v51 = vadd.f32 %v1676_v6, %v1098_v9 }
0x2189   :  { %v2404_v10 = vpop.f32.mrf.mxu1 }
0x218a   :  { %v1681_v12 = vmul.f32 0.5, %v1680_v51 }
0x218c   :  { %v1682_v16 = vsel %vm2690_vm4, %v1680_v51, %v1681_v12 }
0x218d   :  { %2512 = vtanh.f32 %v1682_v16 }
0x219a   :  { %v2513_v52 = vpop.eup %2512 }
0x219b   :  { %v1684_v18 = vmul.f32 0.5, %v2513_v52 }
0x219d   :  { %v1685_v11 = vadd.f32 0.5, %v1684_v18 }
0x219f   :  { %v1686_v53 = vsel %vm2690_vm4, %v2513_v52, %v1685_v11 }
0x21a0   :  { %1689 = vrot.lane.b32.xlu0 %v1686_v53, %s2526_s3  ;;  %v1687_v62 = vmul.f32 %v1686_v53, %v1598_v4  ;;  %v1108_v4 = vadd.f32 %v2989_v17, %v2918_v1 }
0x2212   :  { %v1690_v8 = vpop.permute.xlu0 %1689 }
0x2213   :  { %v1692_v54 = vmul.f32 %v1690_v8, %v1686_v53 }
0x2215   :  { %1694 = vrot.lane.b32.xlu1 %v1692_v54, %s2527_s26 }
0x2287   :  { %v1695_v19 = vpop.permute.xlu1 %1694 }
0x2288   :  { %v3066_v21 = vadd.f32 %v1695_v19, %v1687_v62 }
0x228a   :  { %2514 = vtanh.f32 %v3066_v21 }
0x2297   :  { %v2515_v24 = vpop.eup %2514 }
0x2298   :  { %1700 = vrot.lane.b32.xlu0 %v2515_v24, %s2526_s3 }
0x230a   :  { %v1701_v14 = vpop.permute.xlu0 %1700 }
0x230b   :  { %v1703_v15 = vmul.f32 %v1701_v14, %v1686_v53 }
0x230d   :  { %1705 = vrot.lane.b32.xlu1 %v1703_v15, %s2527_s26 }
0x237f   :  { %v1706_v26 = vpop.permute.xlu1 %1705 }
0x2380   :  { %2414 = vmatmul.mubr.msk.f32.vlgmr.msra.gmra.mxu0 %vm59_vm0, %v1706_v26 }
0x2381   :  { %2428 = vmatpush3.msra.mxu0 %v1917_v13  ;;  %2435 = vmatprep.mubr.msk.f32.mxu0 %vm59_vm0, %v2935_v31  ;;  %v1103_v31 = vadd.f32 %v2918_v1, %v2991_v2 }
0x2382   :  { %2429 = vmatprep.subr.mxu0 %v1916_v28 }
0x2383   :  { %2430 = vmatpush3.msra.mxu0 %v1916_v28 }
0x2384   :  { %2431 = vmatprep.subr.mxu0 %v1915_v29 }
0x2385   :  { %2432 = vmatpush3.msra.mxu0 %v1915_v29 }
0x2386   :  { %2433 = vmatprep.subr.mxu0 %v1914_v30 }
0x2387   :  { %2434 = vmatpush3.msra.mxu0 %v1914_v30 }
0x2388   :  { %2436 = vmatmul.mubr.msk.f32.vlgmr.msra.gmra.mxu0 %vm59_vm0, %v2971_v59 }
0x2389   :  { %2438 = vmatprep.mubr.msk.f32.mxu0 %vm59_vm0, %v3002_v25  ;;  %v3101_v25 = vld [vmem:[%s3177_s8] ss:$0 sm:$0xff] }
0x238c   :  { %2439 = vmatmul.mubr.msk.f32.gmra.mxu0 %vm59_vm0, %v3025_v45 }
0x238d   :  { %2441 = vmatprep.mubr.msk.f32.mxu0 %vm59_vm0, %v1607_v22 }
0x2390   :  { %2442 = vmatmul.mubr.msk.f32.gmra.mxu0 %vm59_vm0, %v1706_v26 }
0x2440   :  { %v1775_v33 = vpop.f32.mrf.mxu0 }
0x2441   :  { %v1779_v34 = vadd.f32 %v1775_v33, %v1103_v31 }
0x2442   :  { %v2415_v36 = vpop.f32.mrf.mxu0 }
0x2443   :  { %v1780_v37 = vmul.f32 0.5, %v1779_v34 }
0x2445   :  { %v1781_v59 = vsel %vm2690_vm4, %v1779_v34, %v1780_v37 }
0x2446   :  { %2516 = vtanh.f32 %v1781_v59 }
0x2448   :  { %v2437_v43 = vpop.f32.mrf.mxu0 }
0x2449   :  { %v1999_v38 = vadd.f32 %v2437_v43, %v3101_v25 }
0x244a   :  { %v1993_v39 = vpop.f32.mrf.mxu0 }
0x244b   :  { %2033 = vst [vmem:[%s3178_s9 + $0x8] sm:$0xff] %v1999_v38  ;;  %v1994_v2 = vadd.f32 %v3101_v25, %v1993_v39 }
0x244c   :  { %v2440_v40 = vpop.f32.mrf.mxu0 }
0x244d   :  { %2032 = vst [vmem:[%s3178_s9] sm:$0xff] %v1994_v2  ;;  %v2009_v41 = vadd.f32 %v2440_v40, %v3101_v25 }
0x244e   :  { %v2003_v0 = vpop.f32.mrf.mxu0 }
0x244f   :  { %2035 = vst [vmem:[%s3178_s9 + $0x18] sm:$0xff] %v2009_v41  ;;  %v2004_v42 = vadd.f32 %v3101_v25, %v2003_v0 }
0x2450   :  { %v2443_v32 = vpop.f32.mrf.mxu0 }
0x2451   :  { %2034 = vst [vmem:[%s3178_s9 + $0x10] sm:$0xff] %v2004_v42  ;;  %v2019_v44 = vadd.f32 %v2443_v32, %v3101_v25 }
0x2452   :  { %v2013_v45 = vpop.f32.mrf.mxu0 }
0x2453   :  { %v2517_v46 = vpop.eup %2516  ;;  %2037 = vst [vmem:[%s3178_s9 + $0x28] sm:$0xff] %v2019_v44  ;;  %v2014_v47 = vadd.f32 %v3101_v25, %v2013_v45 }
0x2454   :  { %v1783_v23 = vmul.f32 0.5, %v2517_v46 }
0x2455   :  { %2036 = vst [vmem:[%s3178_s9 + $0x20] sm:$0xff] %v2014_v47 }
0x2456   :  { %v1784_v48 = vadd.f32 0.5, %v1783_v23 }
0x2458   :  { %v1785_v49 = vsel %vm2690_vm4, %v2517_v46, %v1784_v48 }
0x2459   :  { %1788 = vrot.lane.b32.xlu0 %v1785_v49, %s2526_s3  ;;  %v1786_v56 = vmul.f32 %v1785_v49, %v3066_v21 }
0x24cb   :  { %v1789_v50 = vpop.permute.xlu0 %1788 }
0x24cc   :  { %v1791_v55 = vmul.f32 %v1789_v50, %v1785_v49 }
0x24ce   :  { %1793 = vrot.lane.b32.xlu1 %v1791_v55, %s2527_s26 }
0x2540   :  { %v1794_v57 = vpop.permute.xlu1 %1793 }
0x2541   :  { %v1796_v58 = vadd.f32 %v1794_v57, %v1786_v56 }
0x2543   :  { %2518 = vtanh.f32 %v1796_v58 }
0x2550   :  { %v2519_v60 = vpop.eup %2518 }
0x2551   :  { %1799 = vrot.lane.b32.xlu0 %v2519_v60, %s2526_s3 }
0x25c3   :  { %v1800_v61 = vpop.permute.xlu0 %1799 }
0x25c4   :  { %v1802_v63 = vmul.f32 %v1800_v61, %v1785_v49 }
0x25c6   :  { %1804 = vrot.lane.b32.xlu1 %v1802_v63, %s2527_s26 }
0x2638   :  { %v1805_v3 = vpop.permute.xlu1 %1804 }
0x2639   :  { %2425 = vmatmul.mubr.msk.f32.vlgmr.msra.gmra.mxu1 %vm59_vm0, %v1805_v3  ;;  %2444 = vmatprep.mubr.msk.f32.mxu0 %vm59_vm0, %v1805_v3 }
0x26f9   :  { %v1874_v5 = vpop.f32.mrf.mxu1 }
0x26fa   :  { %v1878_v7 = vadd.f32 %v1874_v5, %v1108_v4 }
0x26fb   :  { %v2426_v20 = vpop.f32.mrf.mxu1 }
0x26fc   :  { %v1879_v22 = vmul.f32 0.5, %v1878_v7 }
0x26fe   :  { %v1880_v9 = vsel %vm2690_vm4, %v1878_v7, %v1879_v22 }
0x26ff   :  { %2520 = vtanh.f32 %v1880_v9 }
0x270c   :  { %v2521_v6 = vpop.eup %2520 }
0x270d   :  { %v1882_v51 = vmul.f32 0.5, %v2521_v6 }
0x270f   :  { %v1883_v10 = vadd.f32 0.5, %v1882_v51 }
0x2711   :  { %v1884_v12 = vsel %vm2690_vm4, %v2521_v6, %v1883_v10 }
0x2712   :  { %1887 = vrot.lane.b32.xlu0 %v1884_v12, %s2526_s3  ;;  %v1885_v1 = vmul.f32 %v1884_v12, %v1796_v58 }
0x2784   :  { %v1888_v16 = vpop.permute.xlu0 %1887 }
0x2785   :  { %v1890_v52 = vmul.f32 %v1888_v16, %v1884_v12 }
0x2787   :  { %1892 = vrot.lane.b32.xlu1 %v1890_v52, %s2527_s26 }
0x27f9   :  { %v1893_v17 = vpop.permute.xlu1 %1892 }
0x27fa   :  { %v1895_v18 = vadd.f32 %v1893_v17, %v1885_v1 }
0x27fc   :  { %2522 = vtanh.f32 %v1895_v18 }
0x2809   :  { %v2523_v11 = vpop.eup %2522 }
0x280a   :  { %1898 = vrot.lane.b32.xlu0 %v2523_v11, %s2526_s3 }
0x280e   :  { %989 = vrot.lane.b32.xlu0 %v2945_v35, %s2528_s5 }
0x287c   :  { %v1899_v53 = vpop.permute.xlu0 %1898 }
0x287d   :  { %v1901_v8 = vmul.f32 %v1899_v53, %v1884_v12 }
0x287f   :  { %1903 = vrot.lane.b32.xlu1 %v1901_v8, %s2527_s26 }
0x2880   :  { %v990_v27 = vpop.permute.xlu0 %989 }
0x2881   :  { %992 = vst.msk [vmem:[%s3179_s11] sm:$0xff] %vm59_vm0, %v990_v27 }
0x2883   :  { %1909 = vrot.lane.b32.xlu1 %v1895_v18, %s2528_s5 }
0x28f1   :  { %v1904_v54 = vpop.permute.xlu1 %1903 }
0x28f2   :  { %2084 = vst.msk [vmem:[%s3175_s10 + $0x8] sm:$0xff] %vm59_vm0, %v1904_v54  ;;  %2445 = vmatmul.mubr.msk.f32.gmra.mxu0 %vm59_vm0, %v1904_v54 }
0x28f5   :  { %v1910_v35 = vpop.permute.xlu1 %1909 }
0x28f6   :  { %2085 = vst.msk [vmem:[%s3179_s11 + $0x8] sm:$0xff] %vm59_vm0, %v1910_v35 }
0x29b2   :  { %v2446_v62 = vpop.f32.mrf.mxu0 }
0x29b3   :  { %v2029_v19 = vadd.f32 %v2446_v62, %v3101_v25 }
0x29b4   :  { %v2023_v21 = vpop.f32.mrf.mxu0 }
0x29b5   :  { %2039 = vst [vmem:[%s3178_s9 + $0x38] sm:$0xff] %v2029_v19  ;;  %v2024_v13 = vadd.f32 %v3101_v25, %v2023_v21 }
0x29b7   :  { %2038 = vst [vmem:[%s3178_s9 + $0x30] sm:$0xff] %v2024_v13 }

</bundles_post_ra>
